<compile_context>
chip_gen: v7x
topology: tpu7x:2x2x1
jax: 0.10.0
libtpu: 0.0.40
codegen_flags: <defaults>
</compile_context>

<pallas_src>
import jax
import jax.numpy as jnp
from jax.experimental import pallas as pl
from jax.experimental.pallas import tpu as pltpu


def _leaky(v):
    # nn.LeakyReLU(0.25)
    return jnp.where(v > 0, v, 0.25 * v)


def _nonlocal_kernel(x_ref, wpc_ref, wup_ref, shift_ref, wla_ref, out_ref):
    """One batch tile.

    x_ref:     (P, Bt, F)    f32 activations (part-major, channels on lanes)
    wpc_ref:   (P, F, 2*C8)  bf16 fused [part_sim | cur_sim] 1x1-conv weights
    wup_ref:   (P, C8, F)    bf16 up_dim weights with the inference-BN scale folded in
    shift_ref: (P, 1, F)     f32 inference-BN shift (beta - mean * gamma / sqrt(var+eps))
    wla_ref:   (P, F, Lpad)  bf16 conv_local_att weights, zero-padded to a 128-lane multiple
    out_ref:   (P, Bt, Lpad) f32 lane-dense output slab
    """
    P = x_ref.shape[0]
    C8 = wpc_ref.shape[2] // 2

    x = x_ref[...]                                   # f32, kept for the residual add
    x_h = x.astype(jnp.bfloat16)                     # bf16 MXU operand

    # Fused part_sim / cur_sim 1x1 convs: one bf16 batched matmul over parts, split after.
    proj = _leaky(jnp.einsum('pbf,pfk->pbk', x_h, wpc_ref[...],
                             preferred_element_type=jnp.float32))      # (P, Bt, 2*C8) f32
    ps = proj[:, :, :C8]
    cs = proj[:, :, C8:]

    # l2norm over channels (torch dim=1): X / (sqrt(sum X^2) + 1e-8); eps placement
    # matches the module. Reciprocal only on the tiny (P, Bt, 1) norm, then multiply.
    ps = ps * (1.0 / (jnp.sqrt(jnp.sum(ps * ps, axis=-1, keepdims=True)) + 1e-8))
    cs = cs * (1.0 / (jnp.sqrt(jnp.sum(cs * cs, axis=-1, keepdims=True)) + 1e-8))

    # Part-to-part attention kept entirely in the (P, Bt, C8) layout. P is tiny (4-8), so
    # PxP matmuls would be <1% MXU utilization and the (P,Bt,C8)<->(Bt,P,C8) transposes are
    # full sublane relayouts; instead do P^2 broadcast-multiply + lane-reduce (scores) and
    # P^2 broadcast-FMA (weighted combination) on the VPU/XLU, fully unrolled.
    # zero_eye: the module adds -1e6 to the i==j score, whose softmax weight underflows to
    # exactly 0 in f32, so dropping the diagonal term is bit-equivalent (requires P >= 2).
    att_cols = []
    for j in range(P):
        cs_j = cs[j]                                                    # (Bt, C8)
        s = [jnp.sum(ps[i] * cs_j, axis=-1, keepdims=True)              # (Bt, 1) scores
             for i in range(P)]
        others = [i for i in range(P) if i != j]
        m = s[others[0]]
        for i in others[1:]:
            m = jnp.maximum(m, s[i])                                    # softmax over torch dim=1
        e = {i: jnp.exp(s[i] - m) for i in others}
        denom = e[others[0]]
        for i in others[1:]:
            denom = denom + e[i]
        inv = pl.reciprocal(denom, approx=True)                         # EUP; inference-grade
        col = (e[others[0]] * inv) * ps[others[0]]
        for i in others[1:]:
            col = col + (e[i] * inv) * ps[i]                            # (Bt, C8) broadcast-FMA
        att_cols.append(col)
    att = jnp.stack(att_cols, axis=0)                                   # (P, Bt, C8)

    # up_dim conv (BN scale pre-folded into the weight) + shift + LeakyReLU, f32 residual
    # add, then the lane-dense local-att conv (unmasked 128-lane vst stores).
    up = jnp.einsum('pbk,pkf->pbf', att.astype(jnp.bfloat16), wup_ref[...],
                    preferred_element_type=jnp.float32)                 # (P, Bt, F)
    y = x + _leaky(up + shift_ref[...])
    out_ref[...] = jnp.einsum('pbf,pfl->pbl', y.astype(jnp.bfloat16), wla_ref[...],
                              preferred_element_type=jnp.float32)       # (P, Bt, Lpad)


def prepare_kernel_params(params, matmul_dtype=jnp.bfloat16):
    """One-time conversion of PyTorch-layout weights into kernel-friendly constants.

    Run once outside the per-call jitted path: weight transposes, part_sim/cur_sim
    fusion, inference-BN folding (scale into the up_dim weight; shift kept separate) and
    lane padding are constants. Matmul operands are stored in bf16 (MXU-native on
    v5e/v6e/v7x; halves resident weight VMEM and weight DMA); accumulation stays f32.
    """
    Wps = params["W_part_sim"]   # (P, C8, F)
    Wcs = params["W_cur_sim"]    # (P, C8, F)
    Wup = params["W_up_dim"]     # (P, F, C8)   (1024 -> F stand-in)
    Wla = params["W_local_att"]  # (P, L, F)    (512 -> L stand-in)
    gamma, beta = params["bn_gamma"], params["bn_beta"]
    rmean, rvar = params["bn_mean"], params["bn_var"]

    P, C8, F = Wps.shape
    L = Wla.shape[1]
    assert P >= 2, "part attention with the -1e6 diagonal mask needs part >= 2"
    assert Wup.shape[1] == F, "residual add requires up_dim output == feature_length"
    Lpad = ((L + 127) // 128) * 128                              # lane-dense output slab

    bn_eps = 1e-5
    inv_std = gamma / jnp.sqrt(rvar + bn_eps)                    # (P, F)
    shift = (beta - rmean * inv_std)[:, None, :]                 # (P, 1, F), stays f32

    wps_t = jnp.transpose(Wps, (0, 2, 1))                        # (P, F, C8)
    wcs_t = jnp.transpose(Wcs, (0, 2, 1))                        # (P, F, C8)
    wpc = jnp.concatenate([wps_t, wcs_t], axis=2)                # (P, F, 2*C8) fused proj
    wup = jnp.transpose(Wup, (0, 2, 1)) * inv_std[:, None, :]    # (P, C8, F), BN scale folded
    wla = jnp.transpose(Wla, (0, 2, 1))                          # (P, F, L)
    wla = jnp.pad(wla, ((0, 0), (0, 0), (0, Lpad - L)))          # zero lanes

    return dict(wpc=wpc.astype(matmul_dtype),
                wup=wup.astype(matmul_dtype),
                wla=wla.astype(matmul_dtype),
                shift=shift.astype(jnp.float32))


def _pick_block_b(B):
    """Default batch tile: sublane-aligned (multiple of 8) with >= 2 grid steps, so x/out
    DMA pipelines against compute and v7x shards the batch axis across both TensorCores.
    Capped at 128 (v5e-native MXU M; safe within v7x's 64 MiB VMEM with bf16 weights);
    on v6e pass block_b=256 explicitly to fill the 256-wide MXU when B allows."""
    for cand in (128, 64, 32, 16, 8):
        if B % cand == 0 and B >= 2 * cand:
            return cand
    return B                      # tiny batches: single grid step


def _vmem_limit_bytes(P, bt, F, C2, Lpad, weight_bytes):
    """Scoped-VMEM budget: single-buffered resident weights + double-buffered x/out blocks
    + f32 intermediates, with 1.5x headroom.  Production shapes exceed the 16 MiB (v5e) /
    32 MiB (v6e, v7x) defaults on the weights alone, so it must be set explicitly."""
    act = 4 * P * bt
    est = (weight_bytes
           + 2 * act * F               # x blocks (double-buffered)
           + 2 * act * Lpad            # out blocks (double-buffered)
           + act * (2 * F + 3 * C2)    # up / y + proj / ps / cs / att intermediates
           + act * F)                  # bf16 copies of x / y and slack
    est = int(est * 1.5) + (2 << 20)
    return max(16 << 20, min(est, 112 << 20))


def nonlocal_net_part_major(x_pbf, kp, *, block_b=None):
    """Core fused forward on the part-major layout.

    x_pbf: (P, B, F) f32 with x_pbf[p, b, :] == embedding[b, :, p]. Returns the lane-dense
    (P, B, Lpad) f32 slab; slice [..., :L]. Production callers should feed / consume this
    layout directly — the (B, F, P) wrapper transposes are whole-tensor HBM passes kept
    only for drop-in PyTorch-layout compatibility.
    """
    P, B, F = x_pbf.shape
    Lpad = kp["wla"].shape[2]
    C2 = kp["wpc"].shape[2]
    if block_b is None:
        block_b = _pick_block_b(B)
    assert B % block_b == 0, (B, block_b)   # TODO(synk): ragged-batch tail handling

    weight_bytes = sum(int(a.size) * jnp.dtype(a.dtype).itemsize for a in kp.values())
    # Grid-invariant weights: whole array resident in VMEM, single-buffered (no pipeline).
    wspec = pl.BlockSpec(memory_space=pltpu.MemorySpace.VMEM)

    return pl.pallas_call(
        _nonlocal_kernel,
        out_shape=jax.ShapeDtypeStruct((P, B, Lpad), jnp.float32),
        grid_spec=pltpu.PrefetchScalarGridSpec(
            num_scalar_prefetch=0,
            grid=(B // block_b,),
            in_specs=[
                pl.BlockSpec((P, block_b, F), lambda b: (0, b, 0)),    # pipelined x tiles
                wspec,   # wpc
                wspec,   # wup (BN scale folded)
                wspec,   # shift
                wspec,   # wla (lane-padded)
            ],
            out_specs=pl.BlockSpec((P, block_b, Lpad), lambda b: (0, b, 0)),
        ),
        compiler_params=pltpu.CompilerParams(
            dimension_semantics=("parallel",),
            vmem_limit_bytes=_vmem_limit_bytes(P, block_b, F, C2, Lpad, weight_bytes),
        ),
    )(x_pbf, kp["wpc"], kp["wup"], kp["shift"], kp["wla"])


def nonlocal_net_forward(embedding, kp, out_dim, block_b=None):
    """embedding: (B, F, P) f32 (PyTorch (N, C, part)). Returns torch-squeezed (B, L, P).

    kp: output of prepare_kernel_params. out_dim: L (static). block_b: batch tile
    (must divide B); default picked by _pick_block_b.
    """
    x = jnp.transpose(embedding, (2, 0, 1)).astype(jnp.float32)   # layout glue only
    out = nonlocal_net_part_major(x, kp, block_b=block_b)
    out = out[:, :, :out_dim]                   # drop lane padding
    result = jnp.transpose(out, (1, 2, 0))      # (B, L, P), matches torch before .squeeze()
    return jnp.squeeze(result)                  # mirrors torch .squeeze() (drops B if B==1)


def init_params(key, P, F, dim_cut=8, L=64):
    """Deterministic, kaiming-style init mirroring the module's __init__ shapes."""
    C8 = F // dim_cut
    ks = jax.random.split(key, 4)

    def kaiming(k, shape):  # torch conv weight (out, in), fan_out kaiming normal
        fan_out = shape[0]
        return jax.random.normal(k, shape, jnp.float32) * jnp.sqrt(2.0 / fan_out)

    Wps = jnp.stack([kaiming(k, (C8, F)) for k in jax.random.split(ks[0], P)])
    Wcs = jnp.stack([kaiming(k, (C8, F)) for k in jax.random.split(ks[1], P)])
    Wup = jnp.stack([kaiming(k, (F, C8)) for k in jax.random.split(ks[2], P)])
    Wla = jnp.stack([kaiming(k, (L, F)) for k in jax.random.split(ks[3], P)])
    return dict(
        W_part_sim=Wps, W_cur_sim=Wcs, W_up_dim=Wup, W_local_att=Wla,
        bn_gamma=jnp.ones((P, F), jnp.float32), bn_beta=jnp.zeros((P, F), jnp.float32),
        bn_mean=jnp.zeros((P, F), jnp.float32), bn_var=jnp.ones((P, F), jnp.float32),
    )


def reference_forward(embedding, params):
    """Pure-JAX f32 mirror of the PyTorch forward (for verification)."""
    Wps, Wcs, Wup, Wla = (params[k] for k in
                          ("W_part_sim", "W_cur_sim", "W_up_dim", "W_local_att"))
    gamma, beta, rmean, rvar = (params[k] for k in
                                ("bn_gamma", "bn_beta", "bn_mean", "bn_var"))
    B, F, P = embedding.shape

    def leaky(v):
        return jnp.where(v > 0, v, 0.25 * v)

    def l2n(X):
        return X / (jnp.sqrt(jnp.sum(X * X, axis=1, keepdims=True)) + 1e-8)

    ps = jnp.stack([leaky(embedding[:, :, p] @ Wps[p].T) for p in range(P)], axis=2)
    cs = jnp.stack([leaky(embedding[:, :, p] @ Wcs[p].T) for p in range(P)], axis=2)
    psn, csn = l2n(ps), l2n(cs)
    A = jnp.einsum('bci,bcj->bij', psn, csn) + (jnp.eye(P, dtype=jnp.float32) * -1e6)[None]
    S = jax.nn.softmax(A, axis=1)
    att = jnp.einsum('bci,bij->bcj', psn, S)  # (B, C8, P)
    inv_std = gamma / jnp.sqrt(rvar + 1e-5)
    up = jnp.stack(
        [leaky((att[:, :, p] @ Wup[p].T) * inv_std[p] + (beta[p] - rmean[p] * inv_std[p]))
         for p in range(P)], axis=2)          # (B, F, P)
    y = embedding + up
    out = jnp.stack([y[:, :, p] @ Wla[p].T for p in range(P)], axis=2)  # (B, L, P)
    return jnp.squeeze(out)


if __name__ == "__main__":
    key = jax.random.PRNGKey(0)
    B, F, P, L = 16, 128, 4, 64   # feature_length=128, dim_cut=8 -> C8=16; part=4
    pkey, xkey = jax.random.split(key)
    params = init_params(pkey, P, F, dim_cut=8, L=L)
    embedding = jax.random.normal(xkey, (B, F, P), dtype=jnp.float32)

    # One-time weight preparation (outside the per-call jitted path).
    kparams = prepare_kernel_params(params)
    kparams = jax.tree_util.tree_map(jax.block_until_ready, kparams)

    fwd = jax.jit(nonlocal_net_forward, static_argnames=("out_dim", "block_b"))
    out = jax.block_until_ready(fwd(embedding, kparams, out_dim=L))

    ref = reference_forward(embedding, params)
    assert out.shape == ref.shape, (out.shape, ref.shape)
    # Tolerance sized for bf16 MXU operands (weights stored bf16, activations cast
    # in-kernel) through two chained F=128 contractions plus the approx EUP reciprocal
    # in the softmax; structural/indexing errors would be orders of magnitude larger.
    if not bool(jnp.allclose(out, ref, atol=1e-1, rtol=5e-2)):
        raise AssertionError(
            f"mismatch vs reference, max abs err = {float(jnp.max(jnp.abs(out - ref)))}")
    print("KERNEL_OK")
</pallas_src>

<mosaic_0001>
module attributes {stable_mosaic.version = 11 : i64} {
  func.func @_nonlocal_kernel(%arg0: i32, %arg1: memref<4x8x128xf32, #tpu.memory_space<vmem>>, %arg2: memref<4x128x32xbf16, #tpu.memory_space<vmem>>, %arg3: memref<4x16x128xbf16, #tpu.memory_space<vmem>>, %arg4: memref<4x1x128xf32, #tpu.memory_space<vmem>>, %arg5: memref<4x128x128xbf16, #tpu.memory_space<vmem>>, %arg6: memref<4x8x128xf32, #tpu.memory_space<vmem>>) attributes {dimension_semantics = [#tpu.dimension_semantics<parallel>], iteration_bounds = array<i64: 2>, scalar_prefetch = 0 : i64, scratch_operands = 0 : i64, tpu.core_type = #tpu.core_type<tc>, window_params = [{transform_indices = @transform_0, window_bounds = array<i64: 4, 8, 128>}, {pipeline_mode = #tpu.pipeline_mode<synchronous>, transform_indices = @transform_1, window_bounds = array<i64: 4, 128, 32>}, {pipeline_mode = #tpu.pipeline_mode<synchronous>, transform_indices = @transform_2, window_bounds = array<i64: 4, 16, 128>}, {pipeline_mode = #tpu.pipeline_mode<synchronous>, transform_indices = @transform_3, window_bounds = array<i64: 4, 1, 128>}, {pipeline_mode = #tpu.pipeline_mode<synchronous>, transform_indices = @transform_4, window_bounds = array<i64: 4, 128, 128>}, {transform_indices = @transform_5, window_bounds = array<i64: 4, 8, 128>}]} {
    %c0 = arith.constant 0 : index
    %c0_0 = arith.constant 0 : index
    %c0_1 = arith.constant 0 : index
    %0 = vector.load %arg1[%c0, %c0_0, %c0_1] : memref<4x8x128xf32, #tpu.memory_space<vmem>>, vector<4x8x128xf32>
    %1 = arith.truncf %0 : vector<4x8x128xf32> to vector<4x8x128xbf16>
    %c0_2 = arith.constant 0 : index
    %c0_3 = arith.constant 0 : index
    %c0_4 = arith.constant 0 : index
    %2 = vector.load %arg2[%c0_2, %c0_3, %c0_4] : memref<4x128x32xbf16, #tpu.memory_space<vmem>>, vector<4x128x32xbf16>
    "tpu.trace_start"() <{level = 10 : i32, message = "pbf,pfk->pbk"}> : () -> ()
    %cst = arith.constant dense<0.000000e+00> : vector<4x8x32xf32>
    %3 = tpu.matmul %1, %2, %cst {dimension_numbers = #tpu.dot_dimension_numbers<[2], [1], [1], [2], [0, 0, 0, 1, 1, 2], [0], [0]>} : vector<4x8x128xbf16>, vector<4x128x32xbf16>, vector<4x8x32xf32> -> vector<4x8x32xf32>
    %cst_5 = arith.constant 0.000000e+00 : f32
    "tpu.trace_stop"() : () -> ()
    %4 = vector.broadcast %cst_5 : f32 to vector<4x8x32xf32>
    %5 = arith.cmpf ogt, %3, %4 : vector<4x8x32xf32>
    %cst_6 = arith.constant 2.500000e-01 : f32
    %6 = vector.broadcast %cst_6 : f32 to vector<4x8x32xf32>
    %7 = arith.mulf %6, %3 : vector<4x8x32xf32>
    %8 = arith.select %5, %3, %7 : vector<4x8x32xi1>, vector<4x8x32xf32>
    %9 = vector.extract_strided_slice %8 {offsets = [0, 0, 0], sizes = [4, 8, 16], strides = [1, 1, 1]} : vector<4x8x32xf32> to vector<4x8x16xf32>
    %10 = vector.extract_strided_slice %8 {offsets = [0, 0, 16], sizes = [4, 8, 16], strides = [1, 1, 1]} : vector<4x8x32xf32> to vector<4x8x16xf32>
    %11 = arith.mulf %9, %9 : vector<4x8x16xf32>
    %cst_7 = arith.constant dense<0.000000e+00> : vector<4x8xf32>
    %12 = vector.multi_reduction <add>, %11, %cst_7 [2] : vector<4x8x16xf32> to vector<4x8xf32>
    %13 = vector.shape_cast %12 : vector<4x8xf32> to vector<4x8x1xf32>
    %14 = math.sqrt %13 : vector<4x8x1xf32>
    %cst_8 = arith.constant 9.99999993E-9 : f32
    %15 = vector.broadcast %cst_8 : f32 to vector<4x8x1xf32>
    %16 = arith.addf %14, %15 : vector<4x8x1xf32>
    %cst_9 = arith.constant 1.000000e+00 : f32
    %17 = vector.broadcast %cst_9 : f32 to vector<4x8x1xf32>
    %18 = arith.divf %17, %16 : vector<4x8x1xf32>
    %19 = vector.broadcast %18 : vector<4x8x1xf32> to vector<4x8x16xf32>
    %20 = arith.mulf %9, %19 : vector<4x8x16xf32>
    %21 = arith.mulf %10, %10 : vector<4x8x16xf32>
    %cst_10 = arith.constant dense<0.000000e+00> : vector<4x8xf32>
    %22 = vector.multi_reduction <add>, %21, %cst_10 [2] : vector<4x8x16xf32> to vector<4x8xf32>
    %23 = vector.shape_cast %22 : vector<4x8xf32> to vector<4x8x1xf32>
    %24 = math.sqrt %23 : vector<4x8x1xf32>
    %cst_11 = arith.constant 9.99999993E-9 : f32
    %25 = vector.broadcast %cst_11 : f32 to vector<4x8x1xf32>
    %26 = arith.addf %24, %25 : vector<4x8x1xf32>
    %cst_12 = arith.constant 1.000000e+00 : f32
    %27 = vector.broadcast %cst_12 : f32 to vector<4x8x1xf32>
    %28 = arith.divf %27, %26 : vector<4x8x1xf32>
    %29 = vector.broadcast %28 : vector<4x8x1xf32> to vector<4x8x16xf32>
    %30 = arith.mulf %10, %29 : vector<4x8x16xf32>
    %31 = vector.extract_strided_slice %30 {offsets = [0, 0, 0], sizes = [1, 8, 16], strides = [1, 1, 1]} : vector<4x8x16xf32> to vector<1x8x16xf32>
    %32 = vector.shape_cast %31 : vector<1x8x16xf32> to vector<8x16xf32>
    %33 = vector.extract_strided_slice %20 {offsets = [1, 0, 0], sizes = [1, 8, 16], strides = [1, 1, 1]} : vector<4x8x16xf32> to vector<1x8x16xf32>
    %34 = vector.shape_cast %33 : vector<1x8x16xf32> to vector<8x16xf32>
    %35 = arith.mulf %34, %32 : vector<8x16xf32>
    %cst_13 = arith.constant dense<0.000000e+00> : vector<8xf32>
    %36 = vector.multi_reduction <add>, %35, %cst_13 [1] : vector<8x16xf32> to vector<8xf32>
    %37 = vector.shape_cast %36 : vector<8xf32> to vector<8x1xf32>
    %38 = vector.extract_strided_slice %20 {offsets = [2, 0, 0], sizes = [1, 8, 16], strides = [1, 1, 1]} : vector<4x8x16xf32> to vector<1x8x16xf32>
    %39 = vector.shape_cast %38 : vector<1x8x16xf32> to vector<8x16xf32>
    %40 = arith.mulf %39, %32 : vector<8x16xf32>
    %cst_14 = arith.constant dense<0.000000e+00> : vector<8xf32>
    %41 = vector.multi_reduction <add>, %40, %cst_14 [1] : vector<8x16xf32> to vector<8xf32>
    %42 = vector.shape_cast %41 : vector<8xf32> to vector<8x1xf32>
    %43 = vector.extract_strided_slice %20 {offsets = [3, 0, 0], sizes = [1, 8, 16], strides = [1, 1, 1]} : vector<4x8x16xf32> to vector<1x8x16xf32>
    %44 = vector.shape_cast %43 : vector<1x8x16xf32> to vector<8x16xf32>
    %45 = arith.mulf %44, %32 : vector<8x16xf32>
    %cst_15 = arith.constant dense<0.000000e+00> : vector<8xf32>
    %46 = vector.multi_reduction <add>, %45, %cst_15 [1] : vector<8x16xf32> to vector<8xf32>
    %47 = vector.shape_cast %46 : vector<8xf32> to vector<8x1xf32>
    %48 = arith.maximumf %37, %42 : vector<8x1xf32>
    %49 = arith.maximumf %48, %47 : vector<8x1xf32>
    %50 = arith.subf %37, %49 : vector<8x1xf32>
    %51 = math.exp %50 : vector<8x1xf32>
    %52 = arith.subf %42, %49 : vector<8x1xf32>
    %53 = math.exp %52 : vector<8x1xf32>
    %54 = arith.subf %47, %49 : vector<8x1xf32>
    %55 = math.exp %54 : vector<8x1xf32>
    %56 = arith.addf %51, %53 : vector<8x1xf32>
    %57 = arith.addf %56, %55 : vector<8x1xf32>
    %58 = tpu.reciprocal %57 {approx = true} : vector<8x1xf32> -> vector<8x1xf32>
    %59 = arith.mulf %51, %58 : vector<8x1xf32>
    %60 = vector.extract_strided_slice %20 {offsets = [1, 0, 0], sizes = [1, 8, 16], strides = [1, 1, 1]} : vector<4x8x16xf32> to vector<1x8x16xf32>
    %61 = vector.shape_cast %60 : vector<1x8x16xf32> to vector<8x16xf32>
    %62 = vector.broadcast %59 : vector<8x1xf32> to vector<8x16xf32>
    %63 = arith.mulf %62, %61 : vector<8x16xf32>
    %64 = arith.mulf %53, %58 : vector<8x1xf32>
    %65 = vector.extract_strided_slice %20 {offsets = [2, 0, 0], sizes = [1, 8, 16], strides = [1, 1, 1]} : vector<4x8x16xf32> to vector<1x8x16xf32>
    %66 = vector.shape_cast %65 : vector<1x8x16xf32> to vector<8x16xf32>
    %67 = vector.broadcast %64 : vector<8x1xf32> to vector<8x16xf32>
    %68 = arith.mulf %67, %66 : vector<8x16xf32>
    %69 = arith.addf %63, %68 : vector<8x16xf32>
    %70 = arith.mulf %55, %58 : vector<8x1xf32>
    %71 = vector.extract_strided_slice %20 {offsets = [3, 0, 0], sizes = [1, 8, 16], strides = [1, 1, 1]} : vector<4x8x16xf32> to vector<1x8x16xf32>
    %72 = vector.shape_cast %71 : vector<1x8x16xf32> to vector<8x16xf32>
    %73 = vector.broadcast %70 : vector<8x1xf32> to vector<8x16xf32>
    %74 = arith.mulf %73, %72 : vector<8x16xf32>
    %75 = arith.addf %69, %74 : vector<8x16xf32>
    %76 = vector.extract_strided_slice %30 {offsets = [1, 0, 0], sizes = [1, 8, 16], strides = [1, 1, 1]} : vector<4x8x16xf32> to vector<1x8x16xf32>
    %77 = vector.shape_cast %76 : vector<1x8x16xf32> to vector<8x16xf32>
    %78 = vector.extract_strided_slice %20 {offsets = [0, 0, 0], sizes = [1, 8, 16], strides = [1, 1, 1]} : vector<4x8x16xf32> to vector<1x8x16xf32>
    %79 = vector.shape_cast %78 : vector<1x8x16xf32> to vector<8x16xf32>
    %80 = arith.mulf %79, %77 : vector<8x16xf32>
    %cst_16 = arith.constant dense<0.000000e+00> : vector<8xf32>
    %81 = vector.multi_reduction <add>, %80, %cst_16 [1] : vector<8x16xf32> to vector<8xf32>
    %82 = vector.shape_cast %81 : vector<8xf32> to vector<8x1xf32>
    %83 = vector.extract_strided_slice %20 {offsets = [2, 0, 0], sizes = [1, 8, 16], strides = [1, 1, 1]} : vector<4x8x16xf32> to vector<1x8x16xf32>
    %84 = vector.shape_cast %83 : vector<1x8x16xf32> to vector<8x16xf32>
    %85 = arith.mulf %84, %77 : vector<8x16xf32>
    %cst_17 = arith.constant dense<0.000000e+00> : vector<8xf32>
    %86 = vector.multi_reduction <add>, %85, %cst_17 [1] : vector<8x16xf32> to vector<8xf32>
    %87 = vector.shape_cast %86 : vector<8xf32> to vector<8x1xf32>
    %88 = vector.extract_strided_slice %20 {offsets = [3, 0, 0], sizes = [1, 8, 16], strides = [1, 1, 1]} : vector<4x8x16xf32> to vector<1x8x16xf32>
    %89 = vector.shape_cast %88 : vector<1x8x16xf32> to vector<8x16xf32>
    %90 = arith.mulf %89, %77 : vector<8x16xf32>
    %cst_18 = arith.constant dense<0.000000e+00> : vector<8xf32>
    %91 = vector.multi_reduction <add>, %90, %cst_18 [1] : vector<8x16xf32> to vector<8xf32>
    %92 = vector.shape_cast %91 : vector<8xf32> to vector<8x1xf32>
    %93 = arith.maximumf %82, %87 : vector<8x1xf32>
    %94 = arith.maximumf %93, %92 : vector<8x1xf32>
    %95 = arith.subf %82, %94 : vector<8x1xf32>
    %96 = math.exp %95 : vector<8x1xf32>
    %97 = arith.subf %87, %94 : vector<8x1xf32>
    %98 = math.exp %97 : vector<8x1xf32>
    %99 = arith.subf %92, %94 : vector<8x1xf32>
    %100 = math.exp %99 : vector<8x1xf32>
    %101 = arith.addf %96, %98 : vector<8x1xf32>
    %102 = arith.addf %101, %100 : vector<8x1xf32>
    %103 = tpu.reciprocal %102 {approx = true} : vector<8x1xf32> -> vector<8x1xf32>
    %104 = arith.mulf %96, %103 : vector<8x1xf32>
    %105 = vector.extract_strided_slice %20 {offsets = [0, 0, 0], sizes = [1, 8, 16], strides = [1, 1, 1]} : vector<4x8x16xf32> to vector<1x8x16xf32>
    %106 = vector.shape_cast %105 : vector<1x8x16xf32> to vector<8x16xf32>
    %107 = vector.broadcast %104 : vector<8x1xf32> to vector<8x16xf32>
    %108 = arith.mulf %107, %106 : vector<8x16xf32>
    %109 = arith.mulf %98, %103 : vector<8x1xf32>
    %110 = vector.extract_strided_slice %20 {offsets = [2, 0, 0], sizes = [1, 8, 16], strides = [1, 1, 1]} : vector<4x8x16xf32> to vector<1x8x16xf32>
    %111 = vector.shape_cast %110 : vector<1x8x16xf32> to vector<8x16xf32>
    %112 = vector.broadcast %109 : vector<8x1xf32> to vector<8x16xf32>
    %113 = arith.mulf %112, %111 : vector<8x16xf32>
    %114 = arith.addf %108, %113 : vector<8x16xf32>
    %115 = arith.mulf %100, %103 : vector<8x1xf32>
    %116 = vector.extract_strided_slice %20 {offsets = [3, 0, 0], sizes = [1, 8, 16], strides = [1, 1, 1]} : vector<4x8x16xf32> to vector<1x8x16xf32>
    %117 = vector.shape_cast %116 : vector<1x8x16xf32> to vector<8x16xf32>
    %118 = vector.broadcast %115 : vector<8x1xf32> to vector<8x16xf32>
    %119 = arith.mulf %118, %117 : vector<8x16xf32>
    %120 = arith.addf %114, %119 : vector<8x16xf32>
    %121 = vector.extract_strided_slice %30 {offsets = [2, 0, 0], sizes = [1, 8, 16], strides = [1, 1, 1]} : vector<4x8x16xf32> to vector<1x8x16xf32>
    %122 = vector.shape_cast %121 : vector<1x8x16xf32> to vector<8x16xf32>
    %123 = vector.extract_strided_slice %20 {offsets = [0, 0, 0], sizes = [1, 8, 16], strides = [1, 1, 1]} : vector<4x8x16xf32> to vector<1x8x16xf32>
    %124 = vector.shape_cast %123 : vector<1x8x16xf32> to vector<8x16xf32>
    %125 = arith.mulf %124, %122 : vector<8x16xf32>
    %cst_19 = arith.constant dense<0.000000e+00> : vector<8xf32>
    %126 = vector.multi_reduction <add>, %125, %cst_19 [1] : vector<8x16xf32> to vector<8xf32>
    %127 = vector.shape_cast %126 : vector<8xf32> to vector<8x1xf32>
    %128 = vector.extract_strided_slice %20 {offsets = [1, 0, 0], sizes = [1, 8, 16], strides = [1, 1, 1]} : vector<4x8x16xf32> to vector<1x8x16xf32>
    %129 = vector.shape_cast %128 : vector<1x8x16xf32> to vector<8x16xf32>
    %130 = arith.mulf %129, %122 : vector<8x16xf32>
    %cst_20 = arith.constant dense<0.000000e+00> : vector<8xf32>
    %131 = vector.multi_reduction <add>, %130, %cst_20 [1] : vector<8x16xf32> to vector<8xf32>
    %132 = vector.shape_cast %131 : vector<8xf32> to vector<8x1xf32>
    %133 = vector.extract_strided_slice %20 {offsets = [3, 0, 0], sizes = [1, 8, 16], strides = [1, 1, 1]} : vector<4x8x16xf32> to vector<1x8x16xf32>
    %134 = vector.shape_cast %133 : vector<1x8x16xf32> to vector<8x16xf32>
    %135 = arith.mulf %134, %122 : vector<8x16xf32>
    %cst_21 = arith.constant dense<0.000000e+00> : vector<8xf32>
    %136 = vector.multi_reduction <add>, %135, %cst_21 [1] : vector<8x16xf32> to vector<8xf32>
    %137 = vector.shape_cast %136 : vector<8xf32> to vector<8x1xf32>
    %138 = arith.maximumf %127, %132 : vector<8x1xf32>
    %139 = arith.maximumf %138, %137 : vector<8x1xf32>
    %140 = arith.subf %127, %139 : vector<8x1xf32>
    %141 = math.exp %140 : vector<8x1xf32>
    %142 = arith.subf %132, %139 : vector<8x1xf32>
    %143 = math.exp %142 : vector<8x1xf32>
    %144 = arith.subf %137, %139 : vector<8x1xf32>
    %145 = math.exp %144 : vector<8x1xf32>
    %146 = arith.addf %141, %143 : vector<8x1xf32>
    %147 = arith.addf %146, %145 : vector<8x1xf32>
    %148 = tpu.reciprocal %147 {approx = true} : vector<8x1xf32> -> vector<8x1xf32>
    %149 = arith.mulf %141, %148 : vector<8x1xf32>
    %150 = vector.extract_strided_slice %20 {offsets = [0, 0, 0], sizes = [1, 8, 16], strides = [1, 1, 1]} : vector<4x8x16xf32> to vector<1x8x16xf32>
    %151 = vector.shape_cast %150 : vector<1x8x16xf32> to vector<8x16xf32>
    %152 = vector.broadcast %149 : vector<8x1xf32> to vector<8x16xf32>
    %153 = arith.mulf %152, %151 : vector<8x16xf32>
    %154 = arith.mulf %143, %148 : vector<8x1xf32>
    %155 = vector.extract_strided_slice %20 {offsets = [1, 0, 0], sizes = [1, 8, 16], strides = [1, 1, 1]} : vector<4x8x16xf32> to vector<1x8x16xf32>
    %156 = vector.shape_cast %155 : vector<1x8x16xf32> to vector<8x16xf32>
    %157 = vector.broadcast %154 : vector<8x1xf32> to vector<8x16xf32>
    %158 = arith.mulf %157, %156 : vector<8x16xf32>
    %159 = arith.addf %153, %158 : vector<8x16xf32>
    %160 = arith.mulf %145, %148 : vector<8x1xf32>
    %161 = vector.extract_strided_slice %20 {offsets = [3, 0, 0], sizes = [1, 8, 16], strides = [1, 1, 1]} : vector<4x8x16xf32> to vector<1x8x16xf32>
    %162 = vector.shape_cast %161 : vector<1x8x16xf32> to vector<8x16xf32>
    %163 = vector.broadcast %160 : vector<8x1xf32> to vector<8x16xf32>
    %164 = arith.mulf %163, %162 : vector<8x16xf32>
    %165 = arith.addf %159, %164 : vector<8x16xf32>
    %166 = vector.extract_strided_slice %30 {offsets = [3, 0, 0], sizes = [1, 8, 16], strides = [1, 1, 1]} : vector<4x8x16xf32> to vector<1x8x16xf32>
    %167 = vector.shape_cast %166 : vector<1x8x16xf32> to vector<8x16xf32>
    %168 = vector.extract_strided_slice %20 {offsets = [0, 0, 0], sizes = [1, 8, 16], strides = [1, 1, 1]} : vector<4x8x16xf32> to vector<1x8x16xf32>
    %169 = vector.shape_cast %168 : vector<1x8x16xf32> to vector<8x16xf32>
    %170 = arith.mulf %169, %167 : vector<8x16xf32>
    %cst_22 = arith.constant dense<0.000000e+00> : vector<8xf32>
    %171 = vector.multi_reduction <add>, %170, %cst_22 [1] : vector<8x16xf32> to vector<8xf32>
    %172 = vector.shape_cast %171 : vector<8xf32> to vector<8x1xf32>
    %173 = vector.extract_strided_slice %20 {offsets = [1, 0, 0], sizes = [1, 8, 16], strides = [1, 1, 1]} : vector<4x8x16xf32> to vector<1x8x16xf32>
    %174 = vector.shape_cast %173 : vector<1x8x16xf32> to vector<8x16xf32>
    %175 = arith.mulf %174, %167 : vector<8x16xf32>
    %cst_23 = arith.constant dense<0.000000e+00> : vector<8xf32>
    %176 = vector.multi_reduction <add>, %175, %cst_23 [1] : vector<8x16xf32> to vector<8xf32>
    %177 = vector.shape_cast %176 : vector<8xf32> to vector<8x1xf32>
    %178 = vector.extract_strided_slice %20 {offsets = [2, 0, 0], sizes = [1, 8, 16], strides = [1, 1, 1]} : vector<4x8x16xf32> to vector<1x8x16xf32>
    %179 = vector.shape_cast %178 : vector<1x8x16xf32> to vector<8x16xf32>
    %180 = arith.mulf %179, %167 : vector<8x16xf32>
    %cst_24 = arith.constant dense<0.000000e+00> : vector<8xf32>
    %181 = vector.multi_reduction <add>, %180, %cst_24 [1] : vector<8x16xf32> to vector<8xf32>
    %182 = vector.shape_cast %181 : vector<8xf32> to vector<8x1xf32>
    %183 = arith.maximumf %172, %177 : vector<8x1xf32>
    %184 = arith.maximumf %183, %182 : vector<8x1xf32>
    %185 = arith.subf %172, %184 : vector<8x1xf32>
    %186 = math.exp %185 : vector<8x1xf32>
    %187 = arith.subf %177, %184 : vector<8x1xf32>
    %188 = math.exp %187 : vector<8x1xf32>
    %189 = arith.subf %182, %184 : vector<8x1xf32>
    %190 = math.exp %189 : vector<8x1xf32>
    %191 = arith.addf %186, %188 : vector<8x1xf32>
    %192 = arith.addf %191, %190 : vector<8x1xf32>
    %193 = tpu.reciprocal %192 {approx = true} : vector<8x1xf32> -> vector<8x1xf32>
    %194 = arith.mulf %186, %193 : vector<8x1xf32>
    %195 = vector.extract_strided_slice %20 {offsets = [0, 0, 0], sizes = [1, 8, 16], strides = [1, 1, 1]} : vector<4x8x16xf32> to vector<1x8x16xf32>
    %196 = vector.shape_cast %195 : vector<1x8x16xf32> to vector<8x16xf32>
    %197 = vector.broadcast %194 : vector<8x1xf32> to vector<8x16xf32>
    %198 = arith.mulf %197, %196 : vector<8x16xf32>
    %199 = arith.mulf %188, %193 : vector<8x1xf32>
    %200 = vector.extract_strided_slice %20 {offsets = [1, 0, 0], sizes = [1, 8, 16], strides = [1, 1, 1]} : vector<4x8x16xf32> to vector<1x8x16xf32>
    %201 = vector.shape_cast %200 : vector<1x8x16xf32> to vector<8x16xf32>
    %202 = vector.broadcast %199 : vector<8x1xf32> to vector<8x16xf32>
    %203 = arith.mulf %202, %201 : vector<8x16xf32>
    %204 = arith.addf %198, %203 : vector<8x16xf32>
    %205 = arith.mulf %190, %193 : vector<8x1xf32>
    %206 = vector.extract_strided_slice %20 {offsets = [2, 0, 0], sizes = [1, 8, 16], strides = [1, 1, 1]} : vector<4x8x16xf32> to vector<1x8x16xf32>
    %207 = vector.shape_cast %206 : vector<1x8x16xf32> to vector<8x16xf32>
    %208 = vector.broadcast %205 : vector<8x1xf32> to vector<8x16xf32>
    %209 = arith.mulf %208, %207 : vector<8x16xf32>
    %210 = arith.addf %204, %209 : vector<8x16xf32>
    %211 = vector.shape_cast %75 : vector<8x16xf32> to vector<1x8x16xf32>
    %212 = vector.shape_cast %120 : vector<8x16xf32> to vector<1x8x16xf32>
    %213 = vector.shape_cast %165 : vector<8x16xf32> to vector<1x8x16xf32>
    %214 = vector.shape_cast %210 : vector<8x16xf32> to vector<1x8x16xf32>
    %215 = tpu.concatenate %211, %212, %213, %214 in 0 : vector<1x8x16xf32>, vector<1x8x16xf32>, vector<1x8x16xf32>, vector<1x8x16xf32> -> vector<4x8x16xf32>
    %216 = arith.truncf %215 : vector<4x8x16xf32> to vector<4x8x16xbf16>
    %c0_25 = arith.constant 0 : index
    %c0_26 = arith.constant 0 : index
    %c0_27 = arith.constant 0 : index
    %217 = vector.load %arg3[%c0_25, %c0_26, %c0_27] : memref<4x16x128xbf16, #tpu.memory_space<vmem>>, vector<4x16x128xbf16>
    "tpu.trace_start"() <{level = 10 : i32, message = "pbk,pkf->pbf"}> : () -> ()
    %cst_28 = arith.constant dense<0.000000e+00> : vector<4x8x128xf32>
    %218 = tpu.matmul %216, %217, %cst_28 {dimension_numbers = #tpu.dot_dimension_numbers<[2], [1], [1], [2], [0, 0, 0, 1, 1, 2], [0], [0]>} : vector<4x8x16xbf16>, vector<4x16x128xbf16>, vector<4x8x128xf32> -> vector<4x8x128xf32>
    "tpu.trace_stop"() : () -> ()
    %c0_29 = arith.constant 0 : index
    %c0_30 = arith.constant 0 : index
    %c0_31 = arith.constant 0 : index
    %219 = vector.load %arg4[%c0_29, %c0_30, %c0_31] : memref<4x1x128xf32, #tpu.memory_space<vmem>>, vector<4x1x128xf32>
    %220 = vector.broadcast %219 : vector<4x1x128xf32> to vector<4x8x128xf32>
    %221 = arith.addf %218, %220 : vector<4x8x128xf32>
    %cst_32 = arith.constant 0.000000e+00 : f32
    %222 = vector.broadcast %cst_32 : f32 to vector<4x8x128xf32>
    %223 = arith.cmpf ogt, %221, %222 : vector<4x8x128xf32>
    %cst_33 = arith.constant 2.500000e-01 : f32
    %224 = vector.broadcast %cst_33 : f32 to vector<4x8x128xf32>
    %225 = arith.mulf %224, %221 : vector<4x8x128xf32>
    %226 = arith.select %223, %221, %225 : vector<4x8x128xi1>, vector<4x8x128xf32>
    %227 = arith.addf %0, %226 : vector<4x8x128xf32>
    %228 = arith.truncf %227 : vector<4x8x128xf32> to vector<4x8x128xbf16>
    %c0_34 = arith.constant 0 : index
    %c0_35 = arith.constant 0 : index
    %c0_36 = arith.constant 0 : index
    %229 = vector.load %arg5[%c0_34, %c0_35, %c0_36] : memref<4x128x128xbf16, #tpu.memory_space<vmem>>, vector<4x128x128xbf16>
    "tpu.trace_start"() <{level = 10 : i32, message = "pbf,pfl->pbl"}> : () -> ()
    %cst_37 = arith.constant dense<0.000000e+00> : vector<4x8x128xf32>
    %230 = tpu.matmul %228, %229, %cst_37 {dimension_numbers = #tpu.dot_dimension_numbers<[2], [1], [1], [2], [0, 0, 0, 1, 1, 2], [0], [0]>} : vector<4x8x128xbf16>, vector<4x128x128xbf16>, vector<4x8x128xf32> -> vector<4x8x128xf32>
    "tpu.trace_stop"() : () -> ()
    %c0_38 = arith.constant 0 : index
    %c0_39 = arith.constant 0 : index
    %c0_40 = arith.constant 0 : index
    %231 = vector.load %arg6[%c0_38, %c0_39, %c0_40] : memref<4x8x128xf32, #tpu.memory_space<vmem>>, vector<4x8x128xf32>
    tpu.vector_store %arg6[%c0_38, %c0_39, %c0_40], %230 {strides = array<i32>} : memref<4x8x128xf32, #tpu.memory_space<vmem>>, vector<4x8x128xf32>,
    return
  }
  func.func @transform_0(%arg0: i32) -> (i32, i32, i32) {
    %c0_i32 = arith.constant 0 : i32
    %c0_i32_0 = arith.constant 0 : i32
    %c0_i32_1 = arith.constant 0 : i32
    return %c0_i32, %arg0, %c0_i32_0 : i32, i32, i32
  }
  func.func @transform_1(%arg0: i32) -> (i32, i32, i32) {
    %c0_i32 = arith.constant 0 : i32
    %c0_i32_0 = arith.constant 0 : i32
    %c0_i32_1 = arith.constant 0 : i32
    %c0_i32_2 = arith.constant 0 : i32
    return %c0_i32, %c0_i32_0, %c0_i32_1 : i32, i32, i32
  }
  func.func @transform_2(%arg0: i32) -> (i32, i32, i32) {
    %c0_i32 = arith.constant 0 : i32
    %c0_i32_0 = arith.constant 0 : i32
    %c0_i32_1 = arith.constant 0 : i32
    %c0_i32_2 = arith.constant 0 : i32
    return %c0_i32, %c0_i32_0, %c0_i32_1 : i32, i32, i32
  }
  func.func @transform_3(%arg0: i32) -> (i32, i32, i32) {
    %c0_i32 = arith.constant 0 : i32
    %c0_i32_0 = arith.constant 0 : i32
    %c0_i32_1 = arith.constant 0 : i32
    %c0_i32_2 = arith.constant 0 : i32
    return %c0_i32, %c0_i32_0, %c0_i32_1 : i32, i32, i32
  }
  func.func @transform_4(%arg0: i32) -> (i32, i32, i32) {
    %c0_i32 = arith.constant 0 : i32
    %c0_i32_0 = arith.constant 0 : i32
    %c0_i32_1 = arith.constant 0 : i32
    %c0_i32_2 = arith.constant 0 : i32
    return %c0_i32, %c0_i32_0, %c0_i32_1 : i32, i32, i32
  }
  func.func @transform_5(%arg0: i32) -> (i32, i32, i32) {
    %c0_i32 = arith.constant 0 : i32
    %c0_i32_0 = arith.constant 0 : i32
    %c0_i32_1 = arith.constant 0 : i32
    return %c0_i32, %arg0, %c0_i32_0 : i32, i32, i32
  }
}

</mosaic_0001>

<bundles_post_ra>
// kernel: nonlocal_net_forward.1
= control target key start
LH: loop header
LB: loop body
LE: loop exit
PB: predicated region body
PF: predicated region fallthrough
CT: control target
= control target key end

     0   :  { %s2343_s18 = smov 0   ;;  %s2345_s19 = smov 0   ;;  %s2821_s0 = inlined_call_operand.vmem [shape: f32[4,16,128], index: 0, kind: input, shape index: {}]   ;;  %s2822_s1 = inlined_call_operand.vmem [shape: bf16[4,128,32], index: 1, kind: input, shape index: {}]   ;;  %s2823_s2 = inlined_call_operand.vmem [shape: bf16[4,16,128], index: 2, kind: input, shape index: {}]   ;;  %s2824_s3 = inlined_call_operand.vmem [shape: f32[4,1,128], index: 3, kind: input, shape index: {}]   ;;  %s2825_s4 = inlined_call_operand.vmem [shape: bf16[4,128,128], index: 4, kind: input, shape index: {}]   ;;  %s2826_s5 = inlined_call_operand.vmem [shape: f32[4,16,128], index: 5, kind: output, shape index: {}]  }
   0x1   :  { %s2347_s20 = smov 0  }
   0x2 LB: > { %s1772_s21 = sadd.s32 4294967295, %s2308_s20   ;;  %s2360_s22 = sadd.s32 1, %s2308_s20   ;;  %s2308_s20 = sphi %s2347_s20, %s2830_s20   ;;  %s2304_s19 = sphi %s2345_s19, %s2829_s19   ;;  %s2300_s18 = sphi %s2343_s18, %s2828_s18  }
   0x3   : > { %s19_s23 = ssub.s32 %s2308_s20, %s2360_s22  ;;  %s22_s24 = sadd.s32 1, %s2304_s19 }
   0x4   : > { %p20_p0 = scmp.eq.s32.totalorder %s19_s23, 0  ;;  %p29_p1 = scmp.ne.s32.totalorder %s2304_s19, %s2300_s18 }
   0x5   : > { %p30_p2 = scmp.eq.s32.totalorder %s2308_s20, 0  ;;  %p143_p3 = scmp.eq.s32.totalorder %s1772_s21, 1 }
   0x6   : > { %s2371_s25 = scalar_select %p20_p0, %s2304_s19, %s22_s24  }
   0x7   : > { %p31_p4 = por %p30_p2, %p29_p1  ;;  %p2373_p5 = por %p143_p3, %p29_p1 }
   0x8   : > { %p1775_p6 = scmp.ge.s32.totalorder %s2308_s20, 2 }
   0xa   : > { %177 = sbr.rel (%p1775_p6) target bundleno = 24 (0x18), region = 32 }
  0x11   : > { %180 = sbr.rel (!%p31_p4) target bundleno = 24 (0x18), region = 36  ;;  %s182_s27 = sand.u32 (%p31_p4), 1, %s2304_s19  }
  0x12   : > { %s1777_s28 = sshll.u32 (%p31_p4), %s2308_s20, 3  ;;  %s1776_s29 = sshll.u32 (%p31_p4), %s182_s27, 5 }
  0x13   : > { %s186_s7 = scalar_lea.vmem (%p31_p4), %s2821_s0, %s1777_s28  ;;  %s184_s8 = scalar_lea.vmem (%p31_p4), [#allocation2], %s1776_s29 }
  0x14   : > { %v220_v0 = vld [vmem:[%s186_s7] sm:$0xff] (%p31_p4)  ;;  %v222_v1 = vld [vmem:[%s186_s7 + $0x10] sm:$0xff] (%p31_p4) }
  0x15   : > { %v224_v2 = vld [vmem:[%s186_s7 + $0x20] sm:$0xff] (%p31_p4)  ;;  %221 = vst [vmem:[%s184_s8] sm:$0xff] (%p31_p4), %v220_v0  ;;  %223 = vst [vmem:[%s184_s8 + $0x8] sm:$0xff] (%p31_p4), %v222_v1  ;;  %v226_v3 = vld [vmem:[%s186_s7 + $0x30] sm:$0xff] (%p31_p4) }
  0x16   : > { %225 = vst [vmem:[%s184_s8 + $0x10] sm:$0xff] (%p31_p4), %v224_v2  ;;  %227 = vst [vmem:[%s184_s8 + $0x18] sm:$0xff] (%p31_p4), %v226_v3 }
  0x18 PF: > { %p1778_p7 = scmp.ge.s32.totalorder %s2308_s20, 1  ;;  %p232_p8 = scmp.lt.s32.totalorder %s2308_s20, 3 }
  0x1a   : > { %p233_p9 = pnand %p1778_p7, %p232_p8 }
  0x1b   : > { %v2152_v4 = vld [vmem:[%s2822_s1] sm:$0xff] (!%p233_p9)   ;;  %v2310_v5 = vmov (!%p233_p9), 0.0   ;;  %v2154_v7 = vld [vmem:[%s2822_s1 + $0x8] sm:$0xff] (!%p233_p9)   ;;  %vm2311_vm0 = vmmov (!%p233_p9), 0   ;;  %v2156_v9 = vld [vmem:[%s2822_s1 + $0x10] sm:$0xff] (!%p233_p9)   ;;  %s239_s11 = sand.u32 (!%p233_p9), 1, %s2300_s18  }
  0x1c   : > { %236 = sbr.rel (%p233_p9) target bundleno = 1355 (0x54b), region = 74  ;;  %1941 = vmatprep.subr.bf16.mxu0 (!%p233_p9), %v2310_v5  ;;  %1961 = vmatprep.subr.bf16.mxu1 (!%p233_p9), %v2310_v5  ;;  %v2153_v6 = vld [vmem:[%s2822_s1 + $0x40] sm:$0xff] (!%p233_p9)   ;;  %v2155_v8 = vld [vmem:[%s2822_s1 + $0x48] sm:$0xff] (!%p233_p9)   ;;  %v2157_v10 = vld [vmem:[%s2822_s1 + $0x50] sm:$0xff] (!%p233_p9)   ;;  %s2438_s16 = sshll.u32 (!%p233_p9), %s239_s11, 5  ;;  %vm706_vm5 = vcmask (!%p233_p9), 130048  }
  0x1d   : > { %1942 = vmatpush3.bf16.msra.mxu0 (!%p233_p9), %v2152_v4  ;;  %1957 = vmatprep.mubr.msk.bf16.mxu0 (!%p233_p9), %vm2311_vm0, %v2310_v5  ;;  %v2158_v11 = vld [vmem:[%s2822_s1 + $0x18] sm:$0xff] (!%p233_p9)   ;;  %v2160_v13 = vld [vmem:[%s2822_s1 + $0x20] sm:$0xff] (!%p233_p9)   ;;  %v2162_v15 = vld [vmem:[%s2822_s1 + $0x28] sm:$0xff] (!%p233_p9)   ;;  %s2455_s6 = scalar_lea.vmem (!%p233_p9), [#allocation2], %s2438_s16  ;;  %s2312_s29 = smov (!%p233_p9), 112  }
  0x1e   : > { %1962 = vmatpush3.bf16.msra.mxu1 (!%p233_p9), %v2153_v6  ;;  %1943 = vmatprep.subr.bf16.mxu0 (!%p233_p9), %v2310_v5  ;;  %v2159_v12 = vld [vmem:[%s2822_s1 + $0x58] sm:$0xff] (!%p233_p9)   ;;  %v2161_v14 = vld [vmem:[%s2822_s1 + $0x60] sm:$0xff] (!%p233_p9)   ;;  %v2163_v16 = vld [vmem:[%s2822_s1 + $0x68] sm:$0xff] (!%p233_p9)   ;;  %s264_s17 = scalar_lea.vmem (!%p233_p9), [#allocation3], %s2438_s16 }
  0x1f   : > { %1963 = vmatprep.subr.bf16.mxu1 (!%p233_p9), %v2310_v5  ;;  %1977 = vmatprep.mubr.msk.bf16.mxu1 (!%p233_p9), %vm2311_vm0, %v2310_v5  ;;  %v2164_v17 = vld [vmem:[%s2822_s1 + $0x30] sm:$0xff] (!%p233_p9)   ;;  %v2166_v19 = vld [vmem:[%s2822_s1 + $0x38] sm:$0xff] (!%p233_p9)   ;;  %v266_v21 = vld [vmem:[%s2455_s6] sm:$0xff] (!%p233_p9) }
  0x20   : > { %v2165_v18 = vld [vmem:[%s2822_s1 + $0x70] sm:$0xff] (!%p233_p9)   ;;  %v2167_v20 = vld [vmem:[%s2822_s1 + $0x78] sm:$0xff] (!%p233_p9)   ;;  %v267_v22 = vld [vmem:[%s2455_s6 + $0x8] sm:$0xff] (!%p233_p9)  ;;  %v270_v23 = vpack.c.bf16 (!%p233_p9), %v266_v21, %v266_v21 }
  0x21   : > { %1944 = vmatpush3.bf16.msra.mxu0 (!%p233_p9), %v2154_v7  ;;  %v271_v24 = vpack.c.bf16 (!%p233_p9), %v267_v22, %v267_v22  ;;  %v2168_v25 = vld [vmem:[%s2822_s1 + $0x80] sm:$0xff] (!%p233_p9)   ;;  %v2169_v27 = vld [vmem:[%s2822_s1 + $0x88] sm:$0xff] (!%p233_p9)   ;;  %v2171_v29 = vld [vmem:[%s2822_s1 + $0x90] sm:$0xff] (!%p233_p9)  }
  0x22   : > { %1964 = vmatpush3.bf16.msra.mxu1 (!%p233_p9), %v2155_v8  ;;  %1945 = vmatprep.subr.bf16.mxu0 (!%p233_p9), %v2310_v5  ;;  %v2170_v26 = vld [vmem:[%s2822_s1 + $0xc0] sm:$0xff] (!%p233_p9)   ;;  %v2172_v28 = vld [vmem:[%s2822_s1 + $0xc8] sm:$0xff] (!%p233_p9)   ;;  %v2174_v30 = vld [vmem:[%s2822_s1 + $0xd0] sm:$0xff] (!%p233_p9)  }
  0x23   : > { %1965 = vmatprep.subr.bf16.mxu1 %v2310_v5  ;;  %v2173_v31 = vld [vmem:[%s2822_s1 + $0x98] sm:$0xff]   ;;  %v2175_v33 = vld [vmem:[%s2822_s1 + $0xa0] sm:$0xff]   ;;  %v2177_v35 = vld [vmem:[%s2822_s1 + $0xa8] sm:$0xff]   ;;  %s1858_s16 = sshll.u32 (%p2373_p5), %s1772_s21, 3 }
  0x24   : > { %v2176_v32 = vld [vmem:[%s2822_s1 + $0xd8] sm:$0xff]   ;;  %v2178_v34 = vld [vmem:[%s2822_s1 + $0xe0] sm:$0xff]   ;;  %v2180_v36 = vld [vmem:[%s2822_s1 + $0xe8] sm:$0xff]   ;;  %s1671_s24 = scalar_lea.vmem (%p2373_p5), %s2826_s5, %s1858_s16 }
  0x25   : > { %1946 = vmatpush3.bf16.msra.mxu0 %v2156_v9  ;;  %v2179_v37 = vld [vmem:[%s2822_s1 + $0xb0] sm:$0xff]   ;;  %v2181_v39 = vld [vmem:[%s2822_s1 + $0xb8] sm:$0xff]  }
  0x26   : > { %1966 = vmatpush3.bf16.msra.mxu1 %v2157_v10  ;;  %1947 = vmatprep.subr.bf16.mxu0 %v2310_v5  ;;  %v2182_v38 = vld [vmem:[%s2822_s1 + $0xf0] sm:$0xff]   ;;  %v2183_v41 = vld [vmem:[%s2822_s1 + $0xf8] sm:$0xff]  }
  0x27   : > { %1967 = vmatprep.subr.bf16.mxu1 %v2310_v5  ;;  %v2525_v40 = vld [vmem:[%s2455_s6 + $0x10] sm:$0xff]  ;;  %v2532_v42 = vld [vmem:[%s2455_s6 + $0x18] sm:$0xff] }
  0x28   : > { %v272_v43 = vpack.c.bf16 %v2525_v40, %v2525_v40  ;;  %v273_v44 = vpack.c.bf16 %v2532_v42, %v2532_v42 }
  0x29   : > { %1948 = vmatpush3.bf16.msra.mxu0 %v2158_v11 }
  0x2a   : > { %1968 = vmatpush3.bf16.msra.mxu1 %v2159_v12  ;;  %1949 = vmatprep.subr.bf16.mxu0 %v2310_v5 }
  0x2b   : > { %1969 = vmatprep.subr.bf16.mxu1 %v2310_v5 }
  0x2d   : > { %1950 = vmatpush3.bf16.msra.mxu0 %v2160_v13 }
  0x2e   : > { %1970 = vmatpush3.bf16.msra.mxu1 %v2161_v14  ;;  %1951 = vmatprep.subr.bf16.mxu0 %v2310_v5 }
  0x2f   : > { %1971 = vmatprep.subr.bf16.mxu1 %v2310_v5 }
  0x31   : > { %1952 = vmatpush3.bf16.msra.mxu0 %v2162_v15 }
  0x32   : > { %1972 = vmatpush3.bf16.msra.mxu1 %v2163_v16  ;;  %1953 = vmatprep.subr.bf16.mxu0 %v2310_v5 }
  0x33   : > { %1973 = vmatprep.subr.bf16.mxu1 %v2310_v5 }
  0x35   : > { %1954 = vmatpush3.bf16.msra.mxu0 %v2164_v17 }
  0x36   : > { %1974 = vmatpush3.bf16.msra.mxu1 %v2165_v18  ;;  %1955 = vmatprep.subr.bf16.mxu0 %v2310_v5 }
  0x37   : > { %1975 = vmatprep.subr.bf16.mxu1 %v2310_v5 }
  0x39   : > { %1956 = vmatpush3.bf16.msra.mxu0 %v2166_v19 }
  0x3a   : > { %1976 = vmatpush3.bf16.msra.mxu1 %v2167_v20  ;;  %1981 = vmatprep.subr.bf16.mxu0 %v2310_v5 }
  0x3b   : > { %2001 = vmatprep.subr.bf16.mxu1 %v2310_v5 }
  0x3c   : > { %1958 = vmatmul.mubr.bf16.vlgmr.msra.gmra.mrb[0].mxu0 %v270_v23 }
  0x3d   : > { %1978 = vmatmul.mubr.bf16.vlgmr.msra.gmra.mrb[0].mxu1 %v271_v24  ;;  %1982 = vmatpush3.bf16.msra.mxu0 %v2168_v25 }
  0x3e   : > { %1983 = vmatprep.subr.bf16.mxu0 %v2310_v5  ;;  %2002 = vmatpush3.bf16.msra.mxu1 %v2170_v26 }
  0x3f   : > { %2003 = vmatprep.subr.bf16.mxu1 %v2310_v5  ;;  %1997 = vmatprep.mubr.msk.bf16.mxu0 %vm2311_vm0, %v2310_v5 }
  0x40   : > { %2017 = vmatprep.mubr.msk.bf16.mxu1 %vm2311_vm0, %v2310_v5 }
  0x41   : > { %1984 = vmatpush3.bf16.msra.mxu0 %v2169_v27 }
  0x42   : > { %1985 = vmatprep.subr.bf16.mxu0 %v2310_v5  ;;  %2004 = vmatpush3.bf16.msra.mxu1 %v2172_v28 }
  0x43   : > { %2005 = vmatprep.subr.bf16.mxu1 %v2310_v5 }
  0x45   : > { %1986 = vmatpush3.bf16.msra.mxu0 %v2171_v29 }
  0x46   : > { %1987 = vmatprep.subr.bf16.mxu0 %v2310_v5  ;;  %2006 = vmatpush3.bf16.msra.mxu1 %v2174_v30 }
  0x47   : > { %2007 = vmatprep.subr.bf16.mxu1 %v2310_v5 }
  0x49   : > { %1988 = vmatpush3.bf16.msra.mxu0 %v2173_v31 }
  0x4a   : > { %1989 = vmatprep.subr.bf16.mxu0 %v2310_v5  ;;  %2008 = vmatpush3.bf16.msra.mxu1 %v2176_v32 }
  0x4b   : > { %2009 = vmatprep.subr.bf16.mxu1 %v2310_v5 }
  0x4d   : > { %1990 = vmatpush3.bf16.msra.mxu0 %v2175_v33 }
  0x4e   : > { %1991 = vmatprep.subr.bf16.mxu0 %v2310_v5  ;;  %2010 = vmatpush3.bf16.msra.mxu1 %v2178_v34 }
  0x4f   : > { %2011 = vmatprep.subr.bf16.mxu1 %v2310_v5 }
  0x51   : > { %1992 = vmatpush3.bf16.msra.mxu0 %v2177_v35 }
  0x52   : > { %1993 = vmatprep.subr.bf16.mxu0 %v2310_v5  ;;  %2012 = vmatpush3.bf16.msra.mxu1 %v2180_v36 }
  0x53   : > { %2013 = vmatprep.subr.bf16.mxu1 %v2310_v5 }
  0x55   : > { %1994 = vmatpush3.bf16.msra.mxu0 %v2179_v37 }
  0x56   : > { %1995 = vmatprep.subr.bf16.mxu0 %v2310_v5  ;;  %2014 = vmatpush3.bf16.msra.mxu1 %v2182_v38 }
  0x57   : > { %2015 = vmatprep.subr.bf16.mxu1 %v2310_v5 }
  0x59   : > { %1996 = vmatpush3.bf16.msra.mxu0 %v2181_v39 }
  0x5a   : > { %2016 = vmatpush3.bf16.msra.mxu1 %v2183_v41  ;;  %2021 = vmatprep.subr.bf16.mxu0 %v2310_v5 }
  0x5b   : > { %2027 = vmatprep.subr.bf16.mxu1 %v2310_v5 }
  0x5c   : > { %1998 = vmatmul.mubr.bf16.vlgmr.msra.gmra.mrb[4].mxu0 %v272_v43 }
  0x5d   : > { %2018 = vmatmul.mubr.bf16.vlgmr.msra.gmra.mrb[4].mxu1 %v273_v44  ;;  %2023 = vmatprep.mubr.msk.bf16.mxu0 %vm2311_vm0, %v2310_v5 }
  0x5e   : > { %2029 = vmatprep.mubr.msk.bf16.mxu1 %vm2311_vm0, %v2310_v5 }
 0x10f   : > { %v420_v45 = vpop.f32.mrb[0].mxu0 }
 0x110   : > { %vm690_vm1 = vcmp.gt.f32.partialorder %v420_v45, 0.0  ;;  %v694_v46 = vmul.f32 0.25, %v420_v45  ;;  %v1959_v47 = vpop.f32.mrb[1].mxu0  ;;  %v508_v48 = vpop.f32.mrb[0].mxu1 }
 0x111   : > { %vm691_vm2 = vcmp.gt.f32.partialorder %v508_v48, 0.0  ;;  %v695_v49 = vmul.f32 0.25, %v508_v48  ;;  %v423_v50 = vpop.f32.mrb[2].mxu0  ;;  %v1979_v51 = vpop.f32.mrb[1].mxu1 }
 0x112   : > { %v2545_v52 = vsel %vm690_vm1, %v420_v45, %v694_v46  ;;  %v1960_v53 = vpop.f32.mrb[3].mxu0  ;;  %v511_v54 = vpop.f32.mrb[2].mxu1 }
 0x113   : > { %v1980_v55 = vpop.f32.mrb[3].mxu1  ;;  %v702_v56 = vmul.f32 %v2545_v52, %v2545_v52  ;;  %v2549_v57 = vsel %vm691_vm2, %v508_v48, %v695_v49 }
 0x114   : > { %v703_v58 = vmul.f32 %v2549_v57, %v2549_v57 }
 0x115   : > { %767 = vrot.lane.b32.xlu0 %v702_v56, %s2312_s29  ;;  %v707_v14 = vsel %vm706_vm5, %v702_v56, 0.0 }
 0x116   : > { %v710_v20 = vsel %vm706_vm5, %v703_v58, 0.0 }
 0x119   : > { %769 = vrot.lane.b32.xlu0 %v703_v58, %s2312_s29 }
 0x12f   : > { %v596_v59 = vpop.f32.mrb[4].mxu0 }
 0x130   : > { %vm692_vm3 = vcmp.gt.f32.partialorder %v596_v59, 0.0  ;;  %v696_v60 = vmul.f32 0.25, %v596_v59  ;;  %v1999_v61 = vpop.f32.mrb[5].mxu0  ;;  %v684_v62 = vpop.f32.mrb[4].mxu1 }
 0x131   : > { %v599_v63 = vpop.f32.mrb[6].mxu0  ;;  %vm693_vm4 = vcmp.gt.f32.partialorder %v684_v62, 0.0  ;;  %v697_v0 = vmul.f32 0.25, %v684_v62  ;;  %v2019_v1 = vpop.f32.mrb[5].mxu1 }
 0x132   : > { %v2555_v2 = vsel %vm692_vm3, %v596_v59, %v696_v60  ;;  %v2000_v3 = vpop.f32.mrb[7].mxu0  ;;  %v687_v4 = vpop.f32.mrb[6].mxu1 }
 0x133   : > { %v2557_v6 = vsel %vm693_vm4, %v684_v62, %v697_v0  ;;  %v704_v7 = vmul.f32 %v2555_v2, %v2555_v2  ;;  %v2020_v8 = vpop.f32.mrb[7].mxu1 }
 0x134   : > { %v705_v9 = vmul.f32 %v2557_v6, %v2557_v6 }
 0x135   : > { %771 = vrot.lane.b32.xlu1 %v704_v7, %s2312_s29  ;;  %v713_v15 = vsel %vm706_vm5, %v704_v7, 0.0 }
 0x136   : > { %v716_v21 = vsel %vm706_vm5, %v705_v9, 0.0 }
 0x139   : > { %773 = vrot.lane.b32.xlu1 %v705_v9, %s2312_s29 }
 0x187   : > { %v768_v10 = vpop.permute.xlu0 %767 }
 0x188   : > { %v779_v11 = vsel %vm706_vm5, %v768_v10, 0.0 }
 0x189   : > { %780 = vadd.xlane.f32.xlu0 %v779_v11 }
 0x18b   : > { %v770_v12 = vpop.permute.xlu0 %769 }
 0x18c   : > { %v782_v13 = vsel %vm706_vm5, %v770_v12, 0.0 }
 0x18d   : > { %783 = vadd.xlane.f32.xlu1 %v782_v13 }
 0x191   : > { %708 = vadd.xlane.f32.xlu1 %v707_v14 }
 0x195   : > { %714 = vadd.xlane.f32.xlu1 %v713_v15 }
 0x1a7   : > { %v772_v16 = vpop.permute.xlu1 %771 }
 0x1a8   : > { %v785_v17 = vsel %vm706_vm5, %v772_v16, 0.0 }
 0x1a9   : > { %786 = vadd.xlane.f32.xlu0 %v785_v17 }
 0x1ab   : > { %v774_v18 = vpop.permute.xlu1 %773 }
 0x1ac   : > { %v788_v19 = vsel %vm706_vm5, %v774_v18, 0.0 }
 0x1ad   : > { %789 = vadd.xlane.f32.xlu0 %v788_v19 }
 0x1b1   : > { %711 = vadd.xlane.f32.xlu0 %v710_v20 }
 0x1b5   : > { %717 = vadd.xlane.f32.xlu0 %v716_v21 }
 0x216   : > { %v781_v22 = vpop.xlane.xlu0 %780 }
 0x217   : > { %2220 = vrsqrt.f32 %v781_v22  ;;  %vm793_vm6 = vcmp.eq.f32.partialorder %v781_v22, inf  ;;  %v796_v26 = vand.u32 2147483648, %v781_v22  ;;  %vm795_vm7 = vcmp.eq.f32.partialorder %v781_v22, 0.0 }
 0x21a   : > { %v784_v23 = vpop.xlane.xlu1 %783 }
 0x21b   : > { %2222 = vrsqrt.f32 %v784_v23  ;;  %vm800_vm8 = vcmp.eq.f32.partialorder %v784_v23, inf  ;;  %v803_v32 = vand.u32 2147483648, %v784_v23  ;;  %vm802_vm9 = vcmp.eq.f32.partialorder %v784_v23, 0.0 }
 0x21e   : > { %v709_v62 = vpop.xlane.xlu1 %708 }
 0x21f   : > { %vm721_vm4 = vcmp.eq.f32.partialorder %v709_v62, inf }
 0x221   : > { %v2221_v24 = vpop.eup %2220 }
 0x222   : > { %v792_v25 = vmul.f32 %v2221_v24, %v781_v22  ;;  %v715_v0 = vpop.xlane.xlu1 %714  ;;  %v724_v24 = vand.u32 2147483648, %v709_v62 }
 0x223   : > { %vm735_vm14 = vcmp.eq.f32.partialorder %v715_v0, inf  ;;  %v738_v13 = vand.u32 2147483648, %v715_v0  ;;  %vm737_vm1 = vcmp.eq.f32.partialorder %v715_v0, 0.0 }
 0x224   : > { %v794_v27 = vsel %vm793_vm6, %v781_v22, %v792_v25 }
 0x225   : > { %v2223_v28 = vpop.eup %2222  ;;  %v797_v29 = vsel %vm795_vm7, %v796_v26, %v794_v27  ;;  %vm723_vm7 = vcmp.eq.f32.partialorder %v709_v62, 0.0 }
 0x226   : > { %v819_v30 = vadd.f32 1e-08, %v797_v29  ;;  %v799_v31 = vmul.f32 %v2223_v28, %v784_v23 }
 0x228   : > { %2224 = vrcp.f32 %v819_v30  ;;  %v801_v33 = vsel %vm800_vm8, %v784_v23, %v799_v31 }
 0x229   : > { %v804_v34 = vsel %vm802_vm9, %v803_v32, %v801_v33 }
 0x22a   : > { %v820_v35 = vadd.f32 1e-08, %v804_v34 }
 0x22c   : > { %2226 = vrcp.f32 %v820_v35 }
 0x232   : > { %v2225_v36 = vpop.eup %2224 }
 0x233   : > { %v831_v37 = vmul.f32 %v2225_v36, %v2545_v52 }
 0x235   : > { %836 = vrot.lane.b32.xlu1 %v831_v37, %s2312_s29 }
 0x236   : > { %v2227_v38 = vpop.eup %2226  ;;  %v787_v39 = vpop.xlane.xlu0 %786 }
 0x237   : > { %2228 = vrsqrt.f32 %v787_v39  ;;  %v832_v41 = vmul.f32 %v2227_v38, %v2549_v57  ;;  %vm807_vm10 = vcmp.eq.f32.partialorder %v787_v39, inf  ;;  %v810_v46 = vand.u32 2147483648, %v787_v39 }
 0x238   : > { %vm809_vm11 = vcmp.eq.f32.partialorder %v787_v39, 0.0 }
 0x239   : > { %874 = vrot.lane.b32.xlu0 %v832_v41, %s2312_s29 }
 0x23a   : > { %v790_v43 = vpop.xlane.xlu0 %789 }
 0x23b   : > { %2230 = vrsqrt.f32 %v790_v43  ;;  %vm814_vm12 = vcmp.eq.f32.partialorder %v790_v43, inf  ;;  %v817_v53 = vand.u32 2147483648, %v790_v43  ;;  %vm816_vm13 = vcmp.eq.f32.partialorder %v790_v43, 0.0 }
 0x23e   : > { %v712_v63 = vpop.xlane.xlu0 %711 }
 0x23f   : > { %vm728_vm15 = vcmp.eq.f32.partialorder %v712_v63, inf  ;;  %v731_v16 = vand.u32 2147483648, %v712_v63  ;;  %vm730_vm3 = vcmp.eq.f32.partialorder %v712_v63, 0.0 }
 0x241   : > { %v2229_v44 = vpop.eup %2228 }
 0x242   : > { %v806_v45 = vmul.f32 %v2229_v44, %v787_v39  ;;  %v718_v1 = vpop.xlane.xlu0 %717 }
 0x243   : > { %vm742_vm2 = vcmp.eq.f32.partialorder %v718_v1, inf  ;;  %v745_v20 = vand.u32 2147483648, %v718_v1  ;;  %vm744_vm6 = vcmp.eq.f32.partialorder %v718_v1, 0.0 }
 0x244   : > { %v808_v47 = vsel %vm807_vm10, %v787_v39, %v806_v45 }
 0x245   : > { %v2231_v48 = vpop.eup %2230  ;;  %v811_v49 = vsel %vm809_vm11, %v810_v46, %v808_v47 }
 0x246   : > { %v821_v50 = vadd.f32 1e-08, %v811_v49  ;;  %v813_v51 = vmul.f32 %v2231_v48, %v790_v43 }
 0x248   : > { %2232 = vrcp.f32 %v821_v50  ;;  %v815_v54 = vsel %vm814_vm12, %v790_v43, %v813_v51 }
 0x249   : > { %v818_v55 = vsel %vm816_vm13, %v817_v53, %v815_v54 }
 0x24a   : > { %v822_v56 = vadd.f32 1e-08, %v818_v55 }
 0x24c   : > { %2234 = vrcp.f32 %v822_v56 }
 0x24d   : > { %2236 = vrsqrt.f32 %v715_v0 }
 0x24e   : > { %2238 = vrsqrt.f32 %v712_v63 }
 0x24f   : > { %2240 = vrsqrt.f32 %v718_v1 }
 0x250   : > { %2242 = vrsqrt.f32 %v709_v62 }
 0x252   : > { %v2233_v58 = vpop.eup %2232 }
 0x253   : > { %v833_v59 = vmul.f32 %v2233_v58, %v2555_v2 }
 0x255   : > { %912 = vrot.lane.b32.xlu1 %v833_v59, %s2312_s29 }
 0x256   : > { %v2235_v60 = vpop.eup %2234 }
 0x257   : > { %v834_v61 = vmul.f32 %v2235_v60, %v2557_v6  ;;  %v2237_v3 = vpop.eup %2236 }
 0x258   : > { %v2239_v4 = vpop.eup %2238  ;;  %v734_v8 = vmul.f32 %v2237_v3, %v715_v0  ;;  %v2185_v3 = vld [vmem:[%s2823_s2 + $0x8] sm:$0xff]  }
 0x259   : > { %950 = vrot.lane.b32.xlu1 %v834_v61, %s2312_s29  ;;  %v2241_v7 = vpop.eup %2240  ;;  %v727_v9 = vmul.f32 %v2239_v4, %v712_v63  ;;  %2028 = vmatpush3.bf16.msra.mxu1 %v2185_v3  ;;  %v2186_v3 = vld [vmem:[%s2823_s2 + $0x10] sm:$0xff]  }
 0x25a   : > { %v2243_v10 = vpop.eup %2242  ;;  %v741_v11 = vmul.f32 %v2241_v7, %v718_v1  ;;  %v736_v12 = vsel %vm735_vm14, %v715_v0, %v734_v8  ;;  %2039 = vmatprep.subr.bf16.mxu1 %v2310_v5 }
 0x25b   : > { %v729_v14 = vsel %vm728_vm15, %v712_v63, %v727_v9  ;;  %v720_v15 = vmul.f32 %v2243_v10, %v709_v62  ;;  %v739_v17 = vsel %vm737_vm1, %v738_v13, %v736_v12 }
 0x25c   : > { %v743_v18 = vsel %vm742_vm2, %v718_v1, %v741_v11  ;;  %v732_v19 = vsel %vm730_vm3, %v731_v16, %v729_v14  ;;  %v749_v22 = vadd.f32 1e-08, %v739_v17  ;;  %v2184_v1 = vld [vmem:[%s2823_s2] sm:$0xff]  }
 0x25d   : > { %v722_v21 = vsel %vm721_vm4, %v709_v62, %v720_v15  ;;  %v746_v23 = vsel %vm744_vm6, %v745_v20, %v743_v18  ;;  %v748_v25 = vadd.f32 1e-08, %v732_v19  ;;  %2022 = vmatpush3.bf16.msra.mxu0 %v2184_v1 }
 0x25e   : > { %v725_v26 = vsel %vm723_vm7, %v724_v24, %v722_v21  ;;  %v750_v27 = vadd.f32 1e-08, %v746_v23  ;;  %2244 = vrcp.f32 %v749_v22  ;;  %2033 = vmatprep.subr.bf16.mxu0 %v2310_v5 }
 0x25f   : > { %2246 = vrcp.f32 %v748_v25  ;;  %v747_v28 = vadd.f32 1e-08, %v725_v26 }
 0x260   : > { %2248 = vrcp.f32 %v750_v27 }
 0x261   : > { %2250 = vrcp.f32 %v747_v28 }
 0x268   : > { %v2245_v29 = vpop.eup %2244 }
 0x269   : > { %v2247_v30 = vpop.eup %2246  ;;  %v2582_v32 = vmul.f32 %v2245_v29, %v2555_v2 }
 0x26a   : > { %v2249_v31 = vpop.eup %2248  ;;  %v2585_v33 = vmul.f32 %v2247_v30, %v2549_v57 }
 0x26b   : > { %v2251_v35 = vpop.eup %2250  ;;  %v2590_v38 = vmul.f32 %v2249_v31, %v2557_v6 }
 0x26c   : > { %v2596_v57 = vmul.f32 %v2251_v35, %v2545_v52 }
 0x2a7   : > { %v837_v34 = vpop.permute.xlu1 %836 }
 0x2a8   : > { %v843_v36 = vmul.f32 %v837_v34, %v2582_v32  ;;  %v839_v37 = vmul.f32 %v837_v34, %v2585_v33  ;;  %v847_v43 = vmul.f32 %v837_v34, %v2590_v38 }
 0x2aa   : > { %v844_v39 = vsel %vm706_vm5, %v843_v36, 0.0  ;;  %v840_v41 = vsel %vm706_vm5, %v839_v37, 0.0  ;;  %v848_v45 = vsel %vm706_vm5, %v847_v43, 0.0 }
 0x2ab   : > { %845 = vadd.xlane.f32.xlu1 %v844_v39  ;;  %841 = vadd.xlane.f32.xlu0 %v840_v41  ;;  %v875_v2 = vpop.permute.xlu0 %874 }
 0x2ac   : > { %v877_v44 = vmul.f32 %v875_v2, %v2596_v57  ;;  %v881_v46 = vmul.f32 %v875_v2, %v2582_v32  ;;  %v885_v48 = vmul.f32 %v875_v2, %v2590_v38 }
 0x2ae   : > { %v878_v6 = vsel %vm706_vm5, %v877_v44, 0.0  ;;  %v882_v47 = vsel %vm706_vm5, %v881_v46, 0.0  ;;  %v886_v49 = vsel %vm706_vm5, %v885_v48, 0.0 }
 0x2af   : > { %849 = vadd.xlane.f32.xlu1 %v848_v45  ;;  %879 = vadd.xlane.f32.xlu0 %v878_v6 }
 0x2b3   : > { %883 = vadd.xlane.f32.xlu0 %v882_v47 }
 0x2b7   : > { %887 = vadd.xlane.f32.xlu0 %v886_v49 }
 0x2c7   : > { %v913_v52 = vpop.permute.xlu1 %912 }
 0x2c8   : > { %v919_v50 = vmul.f32 %v913_v52, %v2585_v33  ;;  %v915_v51 = vmul.f32 %v913_v52, %v2596_v57  ;;  %v923_v62 = vmul.f32 %v913_v52, %v2590_v38 }
 0x2ca   : > { %v920_v53 = vsel %vm706_vm5, %v919_v50, 0.0  ;;  %v916_v54 = vsel %vm706_vm5, %v915_v51, 0.0  ;;  %v924_v0 = vsel %vm706_vm5, %v923_v62, 0.0 }
 0x2cb   : > { %921 = vadd.xlane.f32.xlu0 %v920_v53  ;;  %917 = vadd.xlane.f32.xlu1 %v916_v54  ;;  %v951_v55 = vpop.permute.xlu1 %950 }
 0x2cc   : > { %v957_v56 = vmul.f32 %v951_v55, %v2585_v33  ;;  %v953_v58 = vmul.f32 %v951_v55, %v2596_v57  ;;  %v961_v61 = vmul.f32 %v951_v55, %v2582_v32 }
 0x2ce   : > { %v958_v59 = vsel %vm706_vm5, %v957_v56, 0.0  ;;  %v954_v60 = vsel %vm706_vm5, %v953_v58, 0.0  ;;  %v962_v63 = vsel %vm706_vm5, %v961_v61, 0.0 }
 0x2cf   : > { %959 = vadd.xlane.f32.xlu0 %v958_v59  ;;  %955 = vadd.xlane.f32.xlu1 %v954_v60 }
 0x2d3   : > { %963 = vadd.xlane.f32.xlu0 %v962_v63  ;;  %925 = vadd.xlane.f32.xlu1 %v924_v0 }
 0x338   : > { %v842_v4 = vpop.xlane.xlu0 %841  ;;  %v846_v7 = vpop.xlane.xlu1 %845 }
 0x339   : > { %v851_v8 = vmax.f32 %v842_v4, %v846_v7 }
 0x33c   : > { %v850_v9 = vpop.xlane.xlu1 %849  ;;  %v880_v10 = vpop.xlane.xlu0 %879 }
 0x33d   : > { %v852_v11 = vmax.f32 %v851_v8, %v850_v9 }
 0x33f   : > { %v853_v12 = vsub.f32 %v842_v4, %v852_v11  ;;  %v856_v13 = vsub.f32 %v846_v7, %v852_v11  ;;  %v859_v14 = vsub.f32 %v850_v9, %v852_v11 }
 0x340   : > { %v884_v17 = vpop.xlane.xlu0 %883 }
 0x341   : > { %v854_v15 = vmul.f32 1.442695, %v853_v12  ;;  %v857_v16 = vmul.f32 1.442695, %v856_v13  ;;  %v860_v18 = vmul.f32 1.442695, %v859_v14  ;;  %v889_v19 = vmax.f32 %v880_v10, %v884_v17 }
 0x343   : > { %2252 = vpow2.f32 %v854_v15 }
 0x344   : > { %2254 = vpow2.f32 %v857_v16  ;;  %v888_v20 = vpop.xlane.xlu0 %887 }
 0x345   : > { %2256 = vpow2.f32 %v860_v18  ;;  %v890_v21 = vmax.f32 %v889_v19, %v888_v20 }
 0x347   : > { %v891_v22 = vsub.f32 %v880_v10, %v890_v21  ;;  %v894_v23 = vsub.f32 %v884_v17, %v890_v21  ;;  %v897_v24 = vsub.f32 %v888_v20, %v890_v21 }
 0x349   : > { %v892_v25 = vmul.f32 1.442695, %v891_v22  ;;  %v895_v26 = vmul.f32 1.442695, %v894_v23  ;;  %v898_v27 = vmul.f32 1.442695, %v897_v24 }
 0x34a   : > { %v2187_v23 = vld [vmem:[%s2823_s2 + $0x18] sm:$0xff]  }
 0x34b   : > { %2258 = vpow2.f32 %v892_v25 }
 0x34c   : > { %2260 = vpow2.f32 %v895_v26 }
 0x34d   : > { %v2253_v28 = vpop.eup %2252  ;;  %2262 = vpow2.f32 %v898_v27 }
 0x34e   : > { %v2255_v29 = vpop.eup %2254 }
 0x34f   : > { %v862_v30 = vadd.f32 %v2255_v29, %v2253_v28  ;;  %v2257_v31 = vpop.eup %2256 }
 0x351   : > { %v863_v34 = vadd.f32 %v2257_v31, %v862_v30 }
 0x353   : > { %2264 = vrcp.f32 %v863_v34 }
 0x355   : > { %v2259_v35 = vpop.eup %2258 }
 0x356   : > { %v2261_v36 = vpop.eup %2260 }
 0x357   : > { %v900_v37 = vadd.f32 %v2261_v36, %v2259_v35  ;;  %v2263_v43 = vpop.eup %2262 }
 0x358   : > { %v922_v39 = vpop.xlane.xlu0 %921  ;;  %v918_v41 = vpop.xlane.xlu1 %917 }
 0x359   : > { %v901_v2 = vadd.f32 %v2263_v43, %v900_v37  ;;  %v927_v49 = vmax.f32 %v918_v41, %v922_v39 }
 0x35b   : > { %2266 = vrcp.f32 %v901_v2 }
 0x35c   : > { %v960_v44 = vpop.xlane.xlu0 %959  ;;  %v956_v45 = vpop.xlane.xlu1 %955 }
 0x35d   : > { %v2265_v6 = vpop.eup %2264  ;;  %v965_v52 = vmax.f32 %v956_v45, %v960_v44 }
 0x35e   : > { %v865_v46 = vmul.f32 %v2265_v6, %v2253_v28  ;;  %v867_v47 = vmul.f32 %v2265_v6, %v2255_v29  ;;  %v870_v48 = vmul.f32 %v2265_v6, %v2257_v31 }
 0x360   : > { %v964_v50 = vpop.xlane.xlu0 %963  ;;  %v926_v51 = vpop.xlane.xlu1 %925  ;;  %v866_v53 = vmul.f32 %v865_v46, %v2585_v33  ;;  %v868_v54 = vmul.f32 %v867_v47, %v2582_v32  ;;  %v871_v59 = vmul.f32 %v870_v48, %v2590_v38 }
 0x361   : > { %v966_v55 = vmax.f32 %v965_v52, %v964_v50  ;;  %v928_v56 = vmax.f32 %v927_v49, %v926_v51 }
 0x362   : > { %v869_v58 = vadd.f32 %v868_v54, %v866_v53 }
 0x363   : > { %v967_v60 = vsub.f32 %v956_v45, %v966_v55  ;;  %v970_v61 = vsub.f32 %v960_v44, %v966_v55  ;;  %v973_v62 = vsub.f32 %v964_v50, %v966_v55  ;;  %v929_v63 = vsub.f32 %v918_v41, %v928_v56  ;;  %v2190_v55 = vld [vmem:[%s2825_s4 + $0x40] sm:$0xff]  }
 0x364   : > { %v932_v0 = vsub.f32 %v922_v39, %v928_v56  ;;  %v872_v1 = vadd.f32 %v871_v59, %v869_v58  ;;  %v935_v9 = vsub.f32 %v926_v51, %v928_v56 }
 0x365   : > { %v968_v4 = vmul.f32 1.442695, %v967_v60  ;;  %v971_v7 = vmul.f32 1.442695, %v970_v61  ;;  %v974_v8 = vmul.f32 1.442695, %v973_v62  ;;  %v2267_v10 = vpop.eup %2266 }
 0x366   : > { %v930_v11 = vmul.f32 1.442695, %v929_v63  ;;  %v933_v12 = vmul.f32 1.442695, %v932_v0  ;;  %v987_v13 = vpack.c.bf16 %v872_v1, %v872_v1  ;;  %v903_v14 = vmul.f32 %v2267_v10, %v2259_v35  ;;  %v2191_v60 = vld [vmem:[%s2825_s4 + $0x10] sm:$0xff]   ;;  %v2196_v61 = vld [vmem:[%s2825_s4 + $0x58] sm:$0xff]  }
 0x367   : > { %v905_v15 = vmul.f32 %v2267_v10, %v2261_v36  ;;  %v908_v16 = vmul.f32 %v2267_v10, %v2263_v43  ;;  %2268 = vpow2.f32 %v968_v4  ;;  %v936_v17 = vmul.f32 1.442695, %v935_v9  ;;  %v2193_v62 = vld [vmem:[%s2825_s4 + $0x18] sm:$0xff]   ;;  %v2195_v63 = vld [vmem:[%s2825_s4 + $0x20] sm:$0xff]   ;;  %v2197_v0 = vld [vmem:[%s2825_s4 + $0x28] sm:$0xff]  }
 0x368   : > { %2270 = vpow2.f32 %v971_v7  ;;  %2024 = vmatmul.mubr.msk.bf16.vlgmr.msra.gmra.mrb[8].mxu0 %vm706_vm5, %v987_v13  ;;  %v904_v18 = vmul.f32 %v903_v14, %v2596_v57  ;;  %v2198_v1 = vld [vmem:[%s2825_s4 + $0x60] sm:$0xff]   ;;  %v2200_v4 = vld [vmem:[%s2825_s4 + $0x68] sm:$0xff]   ;;  %v2201_v7 = vld [vmem:[%s2825_s4 + $0x38] sm:$0xff]  }
 0x369   : > { %2272 = vpow2.f32 %v974_v8  ;;  %v906_v19 = vmul.f32 %v905_v15, %v2582_v32  ;;  %2034 = vmatpush3.bf16.msra.mxu0 %v2186_v3  ;;  %2035 = vmatprep.mubr.msk.bf16.mxu0 %vm2311_vm0, %v2310_v5  ;;  %v909_v21 = vmul.f32 %v908_v16, %v2590_v38  ;;  %v2199_v3 = vld [vmem:[%s2825_s4 + $0x30] sm:$0xff]   ;;  %v2203_v9 = vld [vmem:[%s2825_s4 + $0x78] sm:$0xff]   ;;  %v1813_v10 = vld [vmem:[%s2824_s3] ss:$0 sm:$0xff] }
 0x36a   : > { %2274 = vpow2.f32 %v930_v11  ;;  %2045 = vmatprep.subr.bf16.mxu0 %v2310_v5  ;;  %v2202_v8 = vld [vmem:[%s2825_s4 + $0x70] sm:$0xff]  }
 0x36b   : > { %2276 = vpow2.f32 %v933_v12  ;;  %v907_v20 = vadd.f32 %v906_v19, %v904_v18  ;;  %v2284_v18 = vld [vmem:[%s2455_s6] sm:$0xff] }
 0x36c   : > { %2278 = vpow2.f32 %v936_v17 }
 0x36d   : > { %v910_v22 = vadd.f32 %v909_v21, %v907_v20  ;;  %v1814_v20 = vld [vmem:[%s2824_s3 + $0x1] ss:$0 sm:$0xff] }
 0x36e   : > { %v2204_v21 = vld [vmem:[%s2825_s4 + $0x80] sm:$0xff]  }
 0x36f   : > { %v988_v24 = vpack.c.bf16 %v910_v22, %v910_v22 }
 0x371   : > { %v2269_v25 = vpop.eup %2268  ;;  %2030 = vmatmul.mubr.msk.bf16.vlgmr.msra.gmra.mrb[8].mxu1 %vm706_vm5, %v988_v24 }
 0x372   : > { %v2271_v26 = vpop.eup %2270  ;;  %2040 = vmatpush3.bf16.msra.mxu1 %v2187_v23  ;;  %2041 = vmatprep.mubr.msk.bf16.mxu1 %vm2311_vm0, %v2310_v5 }
 0x373   : > { %v2273_v27 = vpop.eup %2272  ;;  %v976_v28 = vadd.f32 %v2271_v26, %v2269_v25  ;;  %2065 = vmatprep.subr.bf16.mxu1 %v2310_v5 }
 0x374   : > { %v2275_v29 = vpop.eup %2274 }
 0x375   : > { %v2277_v30 = vpop.eup %2276  ;;  %v977_v31 = vadd.f32 %v2273_v27, %v976_v28 }
 0x376   : > { %v938_v34 = vadd.f32 %v2277_v30, %v2275_v29  ;;  %v2279_v35 = vpop.eup %2278 }
 0x377   : > { %2280 = vrcp.f32 %v977_v31  ;;  %v2285_v31 = vld [vmem:[%s2455_s6 + $0x8] sm:$0xff] }
 0x378   : > { %v939_v36 = vadd.f32 %v2279_v35, %v938_v34 }
 0x37a   : > { %2282 = vrcp.f32 %v939_v36  ;;  %v2205_v36 = vld [vmem:[%s2825_s4 + $0xc0] sm:$0xff]  }
 0x381   : > { %v2281_v37 = vpop.eup %2280 }
 0x382   : > { %v979_v39 = vmul.f32 %v2281_v37, %v2269_v25  ;;  %v981_v41 = vmul.f32 %v2281_v37, %v2271_v26  ;;  %v984_v43 = vmul.f32 %v2281_v37, %v2273_v27  ;;  %v2206_v27 = vld [vmem:[%s2825_s4 + $0x88] sm:$0xff]  }
 0x384   : > { %v2283_v2 = vpop.eup %2282  ;;  %v980_v44 = vmul.f32 %v979_v39, %v2596_v57  ;;  %v982_v45 = vmul.f32 %v981_v41, %v2585_v33  ;;  %v985_v49 = vmul.f32 %v984_v43, %v2582_v32  ;;  %v2188_v32 = vld [vmem:[%s2825_s4] sm:$0xff]   ;;  %v2210_v39 = vld [vmem:[%s2825_s4 + $0x98] sm:$0xff]   ;;  %v2207_v41 = vld [vmem:[%s2825_s4 + $0xc8] sm:$0xff]  }
 0x385   : > { %v941_v6 = vmul.f32 %v2283_v2, %v2275_v29  ;;  %v943_v46 = vmul.f32 %v2283_v2, %v2277_v30  ;;  %v946_v47 = vmul.f32 %v2283_v2, %v2279_v35  ;;  %v2208_v35 = vld [vmem:[%s2825_s4 + $0x90] sm:$0xff]   ;;  %v2212_v43 = vld [vmem:[%s2825_s4 + $0xa0] sm:$0xff]  }
 0x386   : > { %v983_v48 = vadd.f32 %v982_v45, %v980_v44  ;;  %v2209_v2 = vld [vmem:[%s2825_s4 + $0xd0] sm:$0xff]   ;;  %v2214_v44 = vld [vmem:[%s2825_s4 + $0xa8] sm:$0xff]   ;;  %v2211_v45 = vld [vmem:[%s2825_s4 + $0xd8] sm:$0xff]  }
 0x387   : > { %v942_v52 = vmul.f32 %v941_v6, %v2596_v57  ;;  %v944_v50 = vmul.f32 %v943_v46, %v2585_v33  ;;  %v947_v54 = vmul.f32 %v946_v47, %v2590_v38  ;;  %v2192_v33 = vld [vmem:[%s2825_s4 + $0x48] sm:$0xff]   ;;  %v2194_v57 = vld [vmem:[%s2825_s4 + $0x50] sm:$0xff]   ;;  %v2213_v46 = vld [vmem:[%s2825_s4 + $0xe0] sm:$0xff]  }
 0x388   : > { %v986_v51 = vadd.f32 %v985_v49, %v983_v48  ;;  %v2189_v38 = vld [vmem:[%s2825_s4 + $0x8] sm:$0xff]   ;;  %v2216_v6 = vld [vmem:[%s2825_s4 + $0xb0] sm:$0xff]   ;;  %v1816_v47 = vld [vmem:[%s2824_s3 + $0x3] ss:$0 sm:$0xff] }
 0x389   : > { %v945_v53 = vadd.f32 %v944_v50, %v942_v52  ;;  %v2218_v48 = vld [vmem:[%s2825_s4 + $0xb8] sm:$0xff]   ;;  %v2215_v52 = vld [vmem:[%s2825_s4 + $0xe8] sm:$0xff]   ;;  %v1815_v50 = vld [vmem:[%s2824_s3 + $0x2] ss:$0 sm:$0xff] }
 0x38a   : > { %v990_v56 = vpack.c.bf16 %v986_v51, %v986_v51 }
 0x38b   : > { %v948_v58 = vadd.f32 %v947_v54, %v945_v53 }
 0x38c   : > { %2042 = vmatmul.mubr.msk.bf16.vlgmr.msra.gmra.mrb[12].mxu1 %vm706_vm5, %v990_v56 }
 0x38d   : > { %v989_v59 = vpack.c.bf16 %v948_v58, %v948_v58  ;;  %2066 = vmatpush3.bf16.msra.mxu1 %v2190_v55  ;;  %2081 = vmatprep.mubr.msk.bf16.mxu1 %vm2311_vm0, %v2310_v5 }
 0x38e   : > { %2067 = vmatprep.subr.bf16.mxu1 %v2310_v5 }
 0x38f   : > { %2036 = vmatmul.mubr.msk.bf16.vlgmr.msra.gmra.mrb[12].mxu0 %vm706_vm5, %v989_v59 }
 0x390   : > { %2046 = vmatpush3.bf16.msra.mxu0 %v2188_v32  ;;  %2061 = vmatprep.mubr.msk.bf16.mxu0 %vm2311_vm0, %v2310_v5 }
 0x391   : > { %2047 = vmatprep.subr.bf16.mxu0 %v2310_v5  ;;  %2068 = vmatpush3.bf16.msra.mxu1 %v2192_v33  ;;  %v2217_v33 = vld [vmem:[%s2825_s4 + $0xf0] sm:$0xff]  }
 0x392   : > { %2069 = vmatprep.subr.bf16.mxu1 %v2310_v5 }
 0x394   : > { %2048 = vmatpush3.bf16.msra.mxu0 %v2189_v38 }
 0x395   : > { %2049 = vmatprep.subr.bf16.mxu0 %v2310_v5  ;;  %2070 = vmatpush3.bf16.msra.mxu1 %v2194_v57 }
 0x396   : > { %2071 = vmatprep.subr.bf16.mxu1 %v2310_v5 }
 0x398   : > { %2050 = vmatpush3.bf16.msra.mxu0 %v2191_v60 }
 0x399   : > { %2051 = vmatprep.subr.bf16.mxu0 %v2310_v5  ;;  %2072 = vmatpush3.bf16.msra.mxu1 %v2196_v61 }
 0x39a   : > { %2073 = vmatprep.subr.bf16.mxu1 %v2310_v5 }
 0x39c   : > { %2052 = vmatpush3.bf16.msra.mxu0 %v2193_v62 }
 0x39d   : > { %2053 = vmatprep.subr.bf16.mxu0 %v2310_v5  ;;  %2074 = vmatpush3.bf16.msra.mxu1 %v2198_v1 }
 0x39e   : > { %2075 = vmatprep.subr.bf16.mxu1 %v2310_v5 }
 0x3a0   : > { %2054 = vmatpush3.bf16.msra.mxu0 %v2195_v63  ;;  %v2219_v63 = vld [vmem:[%s2825_s4 + $0xf8] sm:$0xff]  }
 0x3a1   : > { %2055 = vmatprep.subr.bf16.mxu0 %v2310_v5  ;;  %2076 = vmatpush3.bf16.msra.mxu1 %v2200_v4 }
 0x3a2   : > { %2077 = vmatprep.subr.bf16.mxu1 %v2310_v5 }
 0x3a4   : > { %2056 = vmatpush3.bf16.msra.mxu0 %v2197_v0 }
 0x3a5   : > { %2057 = vmatprep.subr.bf16.mxu0 %v2310_v5  ;;  %2078 = vmatpush3.bf16.msra.mxu1 %v2202_v8 }
 0x3a6   : > { %2079 = vmatprep.subr.bf16.mxu1 %v2310_v5 }
 0x3a8   : > { %2058 = vmatpush3.bf16.msra.mxu0 %v2199_v3 }
 0x3a9   : > { %2059 = vmatprep.subr.bf16.mxu0 %v2310_v5  ;;  %2080 = vmatpush3.bf16.msra.mxu1 %v2203_v9 }
 0x3aa   : > { %2105 = vmatprep.subr.bf16.mxu1 %v2310_v5 }
 0x3ac   : > { %2060 = vmatpush3.bf16.msra.mxu0 %v2201_v7 }
 0x3ad   : > { %2085 = vmatprep.subr.bf16.mxu0 %v2310_v5 }
 0x43b   : > { %v1070_v11 = vpop.f32.mrb[8].mxu0 }
 0x43c   : > { %v1071_v12 = vadd.f32 %v1813_v10, %v1070_v11  ;;  %v2025_v13 = vpop.f32.mrb[9].mxu0 }
 0x43d   : > { %v1073_v14 = vpop.f32.mrb[10].mxu0 }
 0x43e   : > { %vm1223_vm5 = vcmp.gt.f32.partialorder %v1071_v12, 0.0  ;;  %v1227_v15 = vmul.f32 0.25, %v1071_v12  ;;  %v2026_v16 = vpop.f32.mrb[11].mxu0 }
 0x440   : > { %v1231_v17 = vsel %vm1223_vm5, %v1071_v12, %v1227_v15 }
 0x441   : > { %v1235_v19 = vadd.f32 %v2284_v18, %v1231_v17 }
 0x443   : > { %v1239_v22 = vpack.c.bf16 %v1235_v19, %v1235_v19 }
 0x444   : > { %v1119_v23 = vpop.f32.mrb[8].mxu1 }
 0x445   : > { %v1120_v24 = vadd.f32 %v1814_v20, %v1119_v23  ;;  %v2031_v25 = vpop.f32.mrb[9].mxu1  ;;  %2062 = vmatmul.mubr.bf16.vlgmr.msra.gmra.mrb[16].mxu0 %v1239_v22 }
 0x446   : > { %v1122_v26 = vpop.f32.mrb[10].mxu1  ;;  %2086 = vmatpush3.bf16.msra.mxu0 %v2204_v21  ;;  %2101 = vmatprep.mubr.msk.bf16.mxu0 %vm2311_vm0, %v2310_v5 }
 0x447   : > { %vm1224_vm8 = vcmp.gt.f32.partialorder %v1120_v24, 0.0  ;;  %v1228_v28 = vmul.f32 0.25, %v1120_v24  ;;  %v2032_v29 = vpop.f32.mrb[11].mxu1  ;;  %2087 = vmatprep.subr.bf16.mxu0 %v2310_v5 }
 0x449   : > { %v1232_v30 = vsel %vm1224_vm8, %v1120_v24, %v1228_v28 }
 0x44a   : > { %v1236_v34 = vadd.f32 %v2285_v31, %v1232_v30  ;;  %2088 = vmatpush3.bf16.msra.mxu0 %v2206_v27 }
 0x44b   : > { %2089 = vmatprep.subr.bf16.mxu0 %v2310_v5 }
 0x44c   : > { %v1240_v37 = vpack.c.bf16 %v1236_v34, %v1236_v34 }
 0x44e   : > { %2082 = vmatmul.mubr.bf16.vlgmr.msra.gmra.mrb[16].mxu1 %v1240_v37  ;;  %2090 = vmatpush3.bf16.msra.mxu0 %v2208_v35 }
 0x44f   : > { %2106 = vmatpush3.bf16.msra.mxu1 %v2205_v36  ;;  %2091 = vmatprep.subr.bf16.mxu0 %v2310_v5 }
 0x450   : > { %2107 = vmatprep.subr.bf16.mxu1 %v2310_v5  ;;  %2121 = vmatprep.mubr.msk.bf16.mxu1 %vm2311_vm0, %v2310_v5 }
 0x452   : > { %2092 = vmatpush3.bf16.msra.mxu0 %v2210_v39 }
 0x453   : > { %2108 = vmatpush3.bf16.msra.mxu1 %v2207_v41  ;;  %2093 = vmatprep.subr.bf16.mxu0 %v2310_v5 }
 0x454   : > { %2109 = vmatprep.subr.bf16.mxu1 %v2310_v5 }
 0x456   : > { %2094 = vmatpush3.bf16.msra.mxu0 %v2212_v43 }
 0x457   : > { %2110 = vmatpush3.bf16.msra.mxu1 %v2209_v2  ;;  %2095 = vmatprep.subr.bf16.mxu0 %v2310_v5 }
 0x458   : > { %2111 = vmatprep.subr.bf16.mxu1 %v2310_v5 }
 0x45a   : > { %2096 = vmatpush3.bf16.msra.mxu0 %v2214_v44 }
 0x45b   : > { %2112 = vmatpush3.bf16.msra.mxu1 %v2211_v45  ;;  %2097 = vmatprep.subr.bf16.mxu0 %v2310_v5 }
 0x45c   : > { %2113 = vmatprep.subr.bf16.mxu1 %v2310_v5 }
 0x45e   : > { %2098 = vmatpush3.bf16.msra.mxu0 %v2216_v6 }
 0x45f   : > { %2114 = vmatpush3.bf16.msra.mxu1 %v2213_v46  ;;  %v1217_v49 = vpop.f32.mrb[12].mxu1  ;;  %2099 = vmatprep.subr.bf16.mxu0 %v2310_v5 }
 0x460   : > { %v1218_v51 = vadd.f32 %v1816_v47, %v1217_v49  ;;  %v2043_v53 = vpop.f32.mrb[13].mxu1  ;;  %2115 = vmatprep.subr.bf16.mxu1 %v2310_v5 }
 0x461   : > { %v1220_v54 = vpop.f32.mrb[14].mxu1 }
 0x462   : > { %v1168_v55 = vpop.f32.mrb[12].mxu0  ;;  %vm1226_vm0 = vcmp.gt.f32.partialorder %v1218_v51, 0.0  ;;  %v1230_v56 = vmul.f32 0.25, %v1218_v51  ;;  %v2044_v58 = vpop.f32.mrb[15].mxu1  ;;  %2100 = vmatpush3.bf16.msra.mxu0 %v2218_v48 }
 0x463   : > { %v1169_v32 = vadd.f32 %v1815_v50, %v1168_v55  ;;  %v2037_v59 = vpop.f32.mrb[13].mxu0  ;;  %2116 = vmatpush3.bf16.msra.mxu1 %v2215_v52 }
 0x464   : > { %v1171_v38 = vpop.f32.mrb[14].mxu0  ;;  %2117 = vmatprep.subr.bf16.mxu1 %v2310_v5  ;;  %v1234_v60 = vsel %vm1226_vm0, %v1218_v51, %v1230_v56 }
 0x465   : > { %vm1225_vm9 = vcmp.gt.f32.partialorder %v1169_v32, 0.0  ;;  %v1229_v57 = vmul.f32 0.25, %v1169_v32  ;;  %v2038_v61 = vpop.f32.mrb[15].mxu0  ;;  %v1238_v1 = vadd.f32 %v1234_v60, %v2532_v42 }
 0x467   : > { %v1233_v62 = vsel %vm1225_vm9, %v1169_v32, %v1229_v57  ;;  %2118 = vmatpush3.bf16.msra.mxu1 %v2217_v33  ;;  %v1242_v4 = vpack.c.bf16 %v1238_v1, %v1238_v1 }
 0x468   : > { %v1237_v0 = vadd.f32 %v1233_v62, %v2525_v40  ;;  %2119 = vmatprep.subr.bf16.mxu1 %v2310_v5 }
 0x46a   : > { %v1241_v3 = vpack.c.bf16 %v1237_v0, %v1237_v0 }
 0x46b   : > { %2120 = vmatpush3.bf16.msra.mxu1 %v2219_v63 }
 0x46c   : > { %2102 = vmatmul.mubr.bf16.vlgmr.msra.gmra.mrb[20].mxu0 %v1241_v3 }
 0x46e   : > { %2122 = vmatmul.mubr.bf16.vlgmr.msra.gmra.mrb[20].mxu1 %v1242_v4 }
 0x518   : > { %v1389_v7 = vpop.f32.mrb[16].mxu0 }
 0x519   : > { %1659 = vst [vmem:[%s264_s17] sm:$0xff] %v1389_v7  ;;  %v2063_v8 = vpop.f32.mrb[17].mxu0 }
 0x51a   : > { %v1392_v9 = vpop.f32.mrb[18].mxu0 }
 0x51b   : > { %v2064_v10 = vpop.f32.mrb[19].mxu0 }
 0x520   : > { %v1705_v20 = vld [vmem:[%s264_s17] sm:$0xff] (%p2373_p5) }
 0x521   : > { %v1477_v11 = vpop.f32.mrb[16].mxu1  ;;  %1706 = vst [vmem:[%s1671_s24] sm:$0xff] (%p2373_p5), %v1705_v20 }
 0x522   : > { %1660 = vst [vmem:[%s264_s17 + $0x8] sm:$0xff] %v1477_v11  ;;  %v2083_v12 = vpop.f32.mrb[17].mxu1 }
 0x523   : > { %v1480_v13 = vpop.f32.mrb[18].mxu1 }
 0x524   : > { %v2084_v40 = vpop.f32.mrb[19].mxu1 }
 0x529   : > { %v1707_v21 = vld [vmem:[%s264_s17 + $0x8] sm:$0xff] (%p2373_p5) }
 0x52a   : > { %1708 = vst [vmem:[%s1671_s24 + $0x10] sm:$0xff] (%p2373_p5), %v1707_v21 }
 0x53e   : > { %1669 = sbr.rel (!%p2373_p5) target bundleno = 1355 (0x54b), region = 82 }
 0x53f   : > { %v1565_v14 = vpop.f32.mrb[20].mxu0 }
 0x540   : > { %1661 = vst [vmem:[%s264_s17 + $0x10] sm:$0xff] %v1565_v14  ;;  %v2103_v42 = vpop.f32.mrb[21].mxu0 }
 0x541   : > { %v1568_v5 = vpop.f32.mrb[22].mxu0  ;;  %v1653_v15 = vpop.f32.mrb[20].mxu1 }
 0x542   : > { %v2104_v16 = vpop.f32.mrb[23].mxu0  ;;  %1662 = vst [vmem:[%s264_s17 + $0x18] sm:$0xff] %v1653_v15  ;;  %v2123_v17 = vpop.f32.mrb[21].mxu1 }
 0x543   : > { %v1656_v18 = vpop.f32.mrb[22].mxu1 }
 0x544   : > { %v2124_v19 = vpop.f32.mrb[23].mxu1 }
 0x547   : > { %v1709_v22 = vld [vmem:[%s264_s17 + $0x10] sm:$0xff] }
 0x548   : > { %1710 = vst [vmem:[%s1671_s24 + $0x20] sm:$0xff] %v1709_v22 }
 0x549   : > { %v1711_v23 = vld [vmem:[%s264_s17 + $0x18] sm:$0xff] }
 0x54a   : > { %1712 = vst [vmem:[%s1671_s24 + $0x30] sm:$0xff] %v1711_v23 }
 0x54b PF: > { %p12_p10 = scmp.ge.s32.totalorder %s2360_s22, 4   ;;  %s2828_s18 = smov %s2304_s19 }
 0x54c   : > { %s2829_s19 = smov %s2371_s25  ;;  %s2830_s20 = smov %s2360_s22 }
 0x54d   :  { %14 = sbr.rel (!%p12_p10) target bundleno = 2 (0x2), region = 151 }

</bundles_post_ra>
